<compile_context>
chip_gen: v7x
topology: tpu7x:2x2x1
jax: 0.10.0
libtpu: 0.0.40
codegen_flags: <defaults>
</compile_context>

<pallas_src>
import functools

import jax
import jax.numpy as jnp
from jax.experimental import pallas as pl
from jax.experimental.pallas import tpu as pltpu


def _fused_attention_kernel(*refs, num_heads, scale, has_qkv_bias, mxu_dtype):
    """One grid step = `batch_block` batch elements; all heads handled in-kernel."""
    if has_qkv_bias:
        x_ref, wqkv_ref, bqkv_ref, wproj_ref, bproj_ref, o_ref = refs
    else:
        x_ref, wqkv_ref, wproj_ref, bproj_ref, o_ref = refs
        bqkv_ref = None

    bb, N, C = x_ref.shape
    H = num_heads
    D = C // H

    # Weights are VMEM-resident (constant index_map -> no re-DMA across steps).
    w_qkv = wqkv_ref[...].astype(mxu_dtype)        # (C, 3C)
    w_proj = wproj_ref[...].astype(mxu_dtype)      # (C, C)
    b_proj = bproj_ref[...].astype(jnp.float32)    # (1, C)

    for b in range(bb):                            # static unroll over batch-block
        x = x_ref[b].astype(mxu_dtype)             # (N, C)

        # qkv = x @ W_qkv (+ b_qkv)  -- f32 accumulation on the MXU.
        qkv = jnp.dot(x, w_qkv, preferred_element_type=jnp.float32)   # (N, 3C)
        if has_qkv_bias:
            qkv = qkv + bqkv_ref[...].astype(jnp.float32)

        # Per-head scaled-dot-product attention, all heads in this grid step.
        head_outs = []
        for h in range(H):
            q = qkv[:, h * D:(h + 1) * D] * scale                      # (N, D) f32
            k = qkv[:, C + h * D:C + (h + 1) * D]                      # (N, D)
            v = qkv[:, 2 * C + h * D:2 * C + (h + 1) * D]              # (N, D)

            # scores: contract last dims directly (no materialized k.T).
            s = jax.lax.dot_general(
                q.astype(mxu_dtype), k.astype(mxu_dtype),
                dimension_numbers=(((1,), (1,)), ((), ())),
                preferred_element_type=jnp.float32)                    # (N, N)

            # softmax in f32; normalization deferred until after PV matmul
            # (N*D multiplies instead of N*N), exact divide for parity.
            m = jnp.max(s, axis=-1, keepdims=True)
            p = jnp.exp(s - m)                                         # unnormalized
            l = jnp.sum(p, axis=-1, keepdims=True)                     # (N, 1)

            o_h = jnp.dot(p.astype(mxu_dtype), v.astype(mxu_dtype),
                          preferred_element_type=jnp.float32)          # (N, D)
            head_outs.append(o_h * (1.0 / l))

        # Concatenated-head output stays in registers (no scratch round-trip).
        attn = jnp.concatenate(head_outs, axis=-1)                     # (N, C)

        # out = attn @ W_proj + b_proj
        out = jnp.dot(attn.astype(mxu_dtype), w_proj,
                      preferred_element_type=jnp.float32)
        out = out + b_proj                                             # (N, C)
        # NOTE: C=32 < 128 -> masked partial stores; lane-dense out slab is a
        # net loss at these tiny tiles and moot at DiT scale (C=1152).
        o_ref[b] = out.astype(o_ref.dtype)


def attention_forward(x, w_qkv, b_qkv, w_proj, b_proj, num_heads,
                      *, mxu_dtype=None, batch_block=1):
    """Fused qkv-projection -> multi-head attention -> output projection.

    mxu_dtype:   dtype fed to the MXU (pass jnp.bfloat16 on v6e/v7x; f32 acc kept).
    batch_block: batch elements per grid step (1 -> grid=(B,) "parallel" for the
                 v7x 2-TC split; B -> single grid step on single-TC v5e/v6e).
    """
    B, N, C = x.shape
    H = num_heads
    assert C % H == 0
    D = C // H
    scale = float(D) ** -0.5
    if mxu_dtype is None:
        mxu_dtype = x.dtype
    assert B % batch_block == 0
    bb = batch_block
    has_qkv_bias = b_qkv is not None

    kernel = functools.partial(
        _fused_attention_kernel, num_heads=H, scale=scale,
        has_qkv_bias=has_qkv_bias, mxu_dtype=mxu_dtype)

    # Cast weights wrapper-side so the VMEM-resident copies use mxu_dtype
    # (halves resident-weight VMEM + weight DMA when bf16 on v6e/v7x).
    w_qkv = w_qkv.astype(mxu_dtype)
    w_proj = w_proj.astype(mxu_dtype)

    in_specs = [pl.BlockSpec((bb, N, C), lambda b: (b, 0, 0))]         # x
    args = [x]
    in_specs.append(pl.BlockSpec((C, 3 * C), lambda b: (0, 0)))        # W_qkv (resident)
    args.append(w_qkv)
    if has_qkv_bias:
        in_specs.append(pl.BlockSpec((1, 3 * C), lambda b: (0, 0)))    # b_qkv (resident)
        args.append(b_qkv.reshape(1, 3 * C))
    in_specs.append(pl.BlockSpec((C, C), lambda b: (0, 0)))            # W_proj (resident)
    args.append(w_proj)
    in_specs.append(pl.BlockSpec((1, C), lambda b: (0, 0)))            # b_proj (resident)
    args.append(b_proj.reshape(1, C))

    return pl.pallas_call(
        kernel,
        out_shape=jax.ShapeDtypeStruct((B, N, C), x.dtype),
        grid=(B // bb,),
        in_specs=in_specs,
        out_specs=pl.BlockSpec((bb, N, C), lambda b: (b, 0, 0)),
        compiler_params=pltpu.CompilerParams(
            dimension_semantics=("parallel",)),
    )(*args)


# ----------------------------------------------------------------------------
# Pure-JAX reference for the correctness check.
# ----------------------------------------------------------------------------
def attention_reference(x, w_qkv, b_qkv, w_proj, b_proj, num_heads):
    B, N, C = x.shape
    H = num_heads
    D = C // H
    scale = float(D) ** -0.5
    qkv = x.reshape(B * N, C) @ w_qkv
    if b_qkv is not None:
        qkv = qkv + b_qkv
    qkv = qkv.reshape(B, N, 3, H, D).transpose(2, 0, 3, 1, 4)
    q, k, v = qkv[0], qkv[1], qkv[2]
    s = jnp.einsum("bhqd,bhkd->bhqk", q * scale, k)
    p = jax.nn.softmax(s, axis=-1)
    o = jnp.einsum("bhqk,bhkd->bhqd", p, v)
    o = o.transpose(0, 2, 1, 3).reshape(B * N, C)
    return (o @ w_proj + b_proj).reshape(B, N, C)


if __name__ == "__main__":
    # Make the kernel's f32-accumulating MXU dots and the XLA reference use the
    # same matmul precision so the parity check below is meaningful.
    jax.config.update("jax_default_matmul_precision", "highest")

    # Small shapes consistent with the module: dim=32, num_heads=8 -> head_dim=4
    B, N, C, H = 2, 8, 32, 8

    key = jax.random.PRNGKey(0)
    k_x, k_wqkv, k_wproj, k_bproj = jax.random.split(key, 4)

    x = jax.random.normal(k_x, (B, N, C), dtype=jnp.float32)

    # Parameters stored as (in, out) so y = x @ W + b.
    w_qkv = jax.random.normal(k_wqkv, (C, 3 * C), dtype=jnp.float32) * (C ** -0.5)
    b_qkv = None                                           # qkv_bias=False
    w_proj = jax.random.normal(k_wproj, (C, C), dtype=jnp.float32) * (C ** -0.5)
    b_proj = jax.random.normal(k_bproj, (C,), dtype=jnp.float32) * 0.02

    ref = attention_reference(x, w_qkv, b_qkv, w_proj, b_proj, num_heads=H)

    # 1) f32 MXU path, grid=(B,) "parallel" (v7x 2-TC batch split): exact parity.
    out = attention_forward(x, w_qkv, b_qkv, w_proj, b_proj, num_heads=H)
    out = jax.block_until_ready(out)
    assert out.shape == (B, N, C)
    assert jnp.allclose(out, ref, atol=1e-3, rtol=1e-3), "f32 mismatch vs reference"

    # 2) Production mode for v6e/v7x: bf16 MXU operands (f32 accumulation),
    #    whole batch folded into one grid step (single-TC v5e/v6e layout).
    out_bf16 = attention_forward(x, w_qkv, b_qkv, w_proj, b_proj, num_heads=H,
                                 mxu_dtype=jnp.bfloat16, batch_block=B)
    out_bf16 = jax.block_until_ready(out_bf16)
    rel_l2 = jnp.linalg.norm(out_bf16 - ref) / jnp.linalg.norm(ref)
    assert float(rel_l2) < 5e-2, f"bf16-operand path rel-L2 too large: {rel_l2}"

    print("KERNEL_OK")
</pallas_src>

<mosaic_0001>
module attributes {stable_mosaic.version = 11 : i64} {
  func.func @_fused_attention_kernel(%arg0: i32, %arg1: memref<1x8x32xf32, #tpu.memory_space<vmem>>, %arg2: memref<32x96xf32, #tpu.memory_space<vmem>>, %arg3: memref<32x32xf32, #tpu.memory_space<vmem>>, %arg4: memref<1x32xf32, #tpu.memory_space<vmem>>, %arg5: memref<1x8x32xf32, #tpu.memory_space<vmem>>) attributes {dimension_semantics = [#tpu.dimension_semantics<parallel>], iteration_bounds = array<i64: 2>, scalar_prefetch = 0 : i64, scratch_operands = 0 : i64, tpu.core_type = #tpu.core_type<tc>, window_params = [{transform_indices = @transform_0, window_bounds = array<i64: 1, 8, 32>}, {pipeline_mode = #tpu.pipeline_mode<synchronous>, transform_indices = @transform_1, window_bounds = array<i64: 32, 96>}, {pipeline_mode = #tpu.pipeline_mode<synchronous>, transform_indices = @transform_2, window_bounds = array<i64: 32, 32>}, {pipeline_mode = #tpu.pipeline_mode<synchronous>, transform_indices = @transform_3, window_bounds = array<i64: 1, 32>}, {transform_indices = @transform_4, window_bounds = array<i64: 1, 8, 32>}]} {
    %c0 = arith.constant 0 : index
    %c0_0 = arith.constant 0 : index
    %0 = vector.load %arg2[%c0, %c0_0] : memref<32x96xf32, #tpu.memory_space<vmem>>, vector<32x96xf32>
    %c0_1 = arith.constant 0 : index
    %c0_2 = arith.constant 0 : index
    %1 = vector.load %arg3[%c0_1, %c0_2] : memref<32x32xf32, #tpu.memory_space<vmem>>, vector<32x32xf32>
    %c0_3 = arith.constant 0 : index
    %c0_4 = arith.constant 0 : index
    %2 = vector.load %arg4[%c0_3, %c0_4] : memref<1x32xf32, #tpu.memory_space<vmem>>, vector<1x32xf32>
    %c0_5 = arith.constant 0 : index
    %c0_6 = arith.constant 0 : index
    %c0_7 = arith.constant 0 : index
    %3 = vector.load %arg1[%c0_5, %c0_6, %c0_7] : memref<1x8x32xf32, #tpu.memory_space<vmem>>, vector<1x8x32xf32>
    %4 = vector.shape_cast %3 : vector<1x8x32xf32> to vector<8x32xf32>
    %cst = arith.constant dense<0.000000e+00> : vector<8x96xf32>
    %5 = tpu.matmul %4, %0, %cst {dimension_numbers = #tpu.dot_dimension_numbers<[1], [0], [0], [1], [0, 0, 1, 1], [], []>, precision = #tpu.contract_precision<fp32>} : vector<8x32xf32>, vector<32x96xf32>, vector<8x96xf32> -> vector<8x96xf32>
    %6 = vector.extract_strided_slice %5 {offsets = [0, 0], sizes = [8, 4], strides = [1, 1]} : vector<8x96xf32> to vector<8x4xf32>
    %cst_8 = arith.constant 5.000000e-01 : f32
    %7 = vector.broadcast %cst_8 : f32 to vector<8x4xf32>
    %8 = arith.mulf %6, %7 : vector<8x4xf32>
    %9 = vector.extract_strided_slice %5 {offsets = [0, 32], sizes = [8, 4], strides = [1, 1]} : vector<8x96xf32> to vector<8x4xf32>
    %10 = vector.extract_strided_slice %5 {offsets = [0, 64], sizes = [8, 4], strides = [1, 1]} : vector<8x96xf32> to vector<8x4xf32>
    %cst_9 = arith.constant dense<0.000000e+00> : vector<8x8xf32>
    %11 = tpu.matmul %8, %9, %cst_9 {dimension_numbers = #tpu.dot_dimension_numbers<[1], [1], [0], [0], [0, 0, 1, 0], [], []>, precision = #tpu.contract_precision<fp32>} : vector<8x4xf32>, vector<8x4xf32>, vector<8x8xf32> -> vector<8x8xf32>
    %cst_10 = arith.constant dense<0xFF800000> : vector<8xf32>
    %12 = vector.multi_reduction <maximumf>, %11, %cst_10 [1] : vector<8x8xf32> to vector<8xf32>
    %13 = vector.shape_cast %12 : vector<8xf32> to vector<8x1xf32>
    %14 = vector.broadcast %13 : vector<8x1xf32> to vector<8x8xf32>
    %15 = arith.subf %11, %14 : vector<8x8xf32>
    %16 = math.exp %15 : vector<8x8xf32>
    %cst_11 = arith.constant dense<0.000000e+00> : vector<8xf32>
    %17 = vector.multi_reduction <add>, %16, %cst_11 [1] : vector<8x8xf32> to vector<8xf32>
    %18 = vector.shape_cast %17 : vector<8xf32> to vector<8x1xf32>
    %cst_12 = arith.constant dense<0.000000e+00> : vector<8x4xf32>
    %19 = tpu.matmul %16, %10, %cst_12 {dimension_numbers = #tpu.dot_dimension_numbers<[1], [0], [0], [1], [0, 0, 1, 1], [], []>, precision = #tpu.contract_precision<fp32>} : vector<8x8xf32>, vector<8x4xf32>, vector<8x4xf32> -> vector<8x4xf32>
    %cst_13 = arith.constant 1.000000e+00 : f32
    %20 = vector.broadcast %cst_13 : f32 to vector<8x1xf32>
    %21 = arith.divf %20, %18 : vector<8x1xf32>
    %22 = vector.broadcast %21 : vector<8x1xf32> to vector<8x4xf32>
    %23 = arith.mulf %19, %22 : vector<8x4xf32>
    %24 = vector.extract_strided_slice %5 {offsets = [0, 4], sizes = [8, 4], strides = [1, 1]} : vector<8x96xf32> to vector<8x4xf32>
    %cst_14 = arith.constant 5.000000e-01 : f32
    %25 = vector.broadcast %cst_14 : f32 to vector<8x4xf32>
    %26 = arith.mulf %24, %25 : vector<8x4xf32>
    %27 = vector.extract_strided_slice %5 {offsets = [0, 36], sizes = [8, 4], strides = [1, 1]} : vector<8x96xf32> to vector<8x4xf32>
    %28 = vector.extract_strided_slice %5 {offsets = [0, 68], sizes = [8, 4], strides = [1, 1]} : vector<8x96xf32> to vector<8x4xf32>
    %cst_15 = arith.constant dense<0.000000e+00> : vector<8x8xf32>
    %29 = tpu.matmul %26, %27, %cst_15 {dimension_numbers = #tpu.dot_dimension_numbers<[1], [1], [0], [0], [0, 0, 1, 0], [], []>, precision = #tpu.contract_precision<fp32>} : vector<8x4xf32>, vector<8x4xf32>, vector<8x8xf32> -> vector<8x8xf32>
    %cst_16 = arith.constant dense<0xFF800000> : vector<8xf32>
    %30 = vector.multi_reduction <maximumf>, %29, %cst_16 [1] : vector<8x8xf32> to vector<8xf32>
    %31 = vector.shape_cast %30 : vector<8xf32> to vector<8x1xf32>
    %32 = vector.broadcast %31 : vector<8x1xf32> to vector<8x8xf32>
    %33 = arith.subf %29, %32 : vector<8x8xf32>
    %34 = math.exp %33 : vector<8x8xf32>
    %cst_17 = arith.constant dense<0.000000e+00> : vector<8xf32>
    %35 = vector.multi_reduction <add>, %34, %cst_17 [1] : vector<8x8xf32> to vector<8xf32>
    %36 = vector.shape_cast %35 : vector<8xf32> to vector<8x1xf32>
    %cst_18 = arith.constant dense<0.000000e+00> : vector<8x4xf32>
    %37 = tpu.matmul %34, %28, %cst_18 {dimension_numbers = #tpu.dot_dimension_numbers<[1], [0], [0], [1], [0, 0, 1, 1], [], []>, precision = #tpu.contract_precision<fp32>} : vector<8x8xf32>, vector<8x4xf32>, vector<8x4xf32> -> vector<8x4xf32>
    %cst_19 = arith.constant 1.000000e+00 : f32
    %38 = vector.broadcast %cst_19 : f32 to vector<8x1xf32>
    %39 = arith.divf %38, %36 : vector<8x1xf32>
    %40 = vector.broadcast %39 : vector<8x1xf32> to vector<8x4xf32>
    %41 = arith.mulf %37, %40 : vector<8x4xf32>
    %42 = vector.extract_strided_slice %5 {offsets = [0, 8], sizes = [8, 4], strides = [1, 1]} : vector<8x96xf32> to vector<8x4xf32>
    %cst_20 = arith.constant 5.000000e-01 : f32
    %43 = vector.broadcast %cst_20 : f32 to vector<8x4xf32>
    %44 = arith.mulf %42, %43 : vector<8x4xf32>
    %45 = vector.extract_strided_slice %5 {offsets = [0, 40], sizes = [8, 4], strides = [1, 1]} : vector<8x96xf32> to vector<8x4xf32>
    %46 = vector.extract_strided_slice %5 {offsets = [0, 72], sizes = [8, 4], strides = [1, 1]} : vector<8x96xf32> to vector<8x4xf32>
    %cst_21 = arith.constant dense<0.000000e+00> : vector<8x8xf32>
    %47 = tpu.matmul %44, %45, %cst_21 {dimension_numbers = #tpu.dot_dimension_numbers<[1], [1], [0], [0], [0, 0, 1, 0], [], []>, precision = #tpu.contract_precision<fp32>} : vector<8x4xf32>, vector<8x4xf32>, vector<8x8xf32> -> vector<8x8xf32>
    %cst_22 = arith.constant dense<0xFF800000> : vector<8xf32>
    %48 = vector.multi_reduction <maximumf>, %47, %cst_22 [1] : vector<8x8xf32> to vector<8xf32>
    %49 = vector.shape_cast %48 : vector<8xf32> to vector<8x1xf32>
    %50 = vector.broadcast %49 : vector<8x1xf32> to vector<8x8xf32>
    %51 = arith.subf %47, %50 : vector<8x8xf32>
    %52 = math.exp %51 : vector<8x8xf32>
    %cst_23 = arith.constant dense<0.000000e+00> : vector<8xf32>
    %53 = vector.multi_reduction <add>, %52, %cst_23 [1] : vector<8x8xf32> to vector<8xf32>
    %54 = vector.shape_cast %53 : vector<8xf32> to vector<8x1xf32>
    %cst_24 = arith.constant dense<0.000000e+00> : vector<8x4xf32>
    %55 = tpu.matmul %52, %46, %cst_24 {dimension_numbers = #tpu.dot_dimension_numbers<[1], [0], [0], [1], [0, 0, 1, 1], [], []>, precision = #tpu.contract_precision<fp32>} : vector<8x8xf32>, vector<8x4xf32>, vector<8x4xf32> -> vector<8x4xf32>
    %cst_25 = arith.constant 1.000000e+00 : f32
    %56 = vector.broadcast %cst_25 : f32 to vector<8x1xf32>
    %57 = arith.divf %56, %54 : vector<8x1xf32>
    %58 = vector.broadcast %57 : vector<8x1xf32> to vector<8x4xf32>
    %59 = arith.mulf %55, %58 : vector<8x4xf32>
    %60 = vector.extract_strided_slice %5 {offsets = [0, 12], sizes = [8, 4], strides = [1, 1]} : vector<8x96xf32> to vector<8x4xf32>
    %cst_26 = arith.constant 5.000000e-01 : f32
    %61 = vector.broadcast %cst_26 : f32 to vector<8x4xf32>
    %62 = arith.mulf %60, %61 : vector<8x4xf32>
    %63 = vector.extract_strided_slice %5 {offsets = [0, 44], sizes = [8, 4], strides = [1, 1]} : vector<8x96xf32> to vector<8x4xf32>
    %64 = vector.extract_strided_slice %5 {offsets = [0, 76], sizes = [8, 4], strides = [1, 1]} : vector<8x96xf32> to vector<8x4xf32>
    %cst_27 = arith.constant dense<0.000000e+00> : vector<8x8xf32>
    %65 = tpu.matmul %62, %63, %cst_27 {dimension_numbers = #tpu.dot_dimension_numbers<[1], [1], [0], [0], [0, 0, 1, 0], [], []>, precision = #tpu.contract_precision<fp32>} : vector<8x4xf32>, vector<8x4xf32>, vector<8x8xf32> -> vector<8x8xf32>
    %cst_28 = arith.constant dense<0xFF800000> : vector<8xf32>
    %66 = vector.multi_reduction <maximumf>, %65, %cst_28 [1] : vector<8x8xf32> to vector<8xf32>
    %67 = vector.shape_cast %66 : vector<8xf32> to vector<8x1xf32>
    %68 = vector.broadcast %67 : vector<8x1xf32> to vector<8x8xf32>
    %69 = arith.subf %65, %68 : vector<8x8xf32>
    %70 = math.exp %69 : vector<8x8xf32>
    %cst_29 = arith.constant dense<0.000000e+00> : vector<8xf32>
    %71 = vector.multi_reduction <add>, %70, %cst_29 [1] : vector<8x8xf32> to vector<8xf32>
    %72 = vector.shape_cast %71 : vector<8xf32> to vector<8x1xf32>
    %cst_30 = arith.constant dense<0.000000e+00> : vector<8x4xf32>
    %73 = tpu.matmul %70, %64, %cst_30 {dimension_numbers = #tpu.dot_dimension_numbers<[1], [0], [0], [1], [0, 0, 1, 1], [], []>, precision = #tpu.contract_precision<fp32>} : vector<8x8xf32>, vector<8x4xf32>, vector<8x4xf32> -> vector<8x4xf32>
    %cst_31 = arith.constant 1.000000e+00 : f32
    %74 = vector.broadcast %cst_31 : f32 to vector<8x1xf32>
    %75 = arith.divf %74, %72 : vector<8x1xf32>
    %76 = vector.broadcast %75 : vector<8x1xf32> to vector<8x4xf32>
    %77 = arith.mulf %73, %76 : vector<8x4xf32>
    %78 = vector.extract_strided_slice %5 {offsets = [0, 16], sizes = [8, 4], strides = [1, 1]} : vector<8x96xf32> to vector<8x4xf32>
    %cst_32 = arith.constant 5.000000e-01 : f32
    %79 = vector.broadcast %cst_32 : f32 to vector<8x4xf32>
    %80 = arith.mulf %78, %79 : vector<8x4xf32>
    %81 = vector.extract_strided_slice %5 {offsets = [0, 48], sizes = [8, 4], strides = [1, 1]} : vector<8x96xf32> to vector<8x4xf32>
    %82 = vector.extract_strided_slice %5 {offsets = [0, 80], sizes = [8, 4], strides = [1, 1]} : vector<8x96xf32> to vector<8x4xf32>
    %cst_33 = arith.constant dense<0.000000e+00> : vector<8x8xf32>
    %83 = tpu.matmul %80, %81, %cst_33 {dimension_numbers = #tpu.dot_dimension_numbers<[1], [1], [0], [0], [0, 0, 1, 0], [], []>, precision = #tpu.contract_precision<fp32>} : vector<8x4xf32>, vector<8x4xf32>, vector<8x8xf32> -> vector<8x8xf32>
    %cst_34 = arith.constant dense<0xFF800000> : vector<8xf32>
    %84 = vector.multi_reduction <maximumf>, %83, %cst_34 [1] : vector<8x8xf32> to vector<8xf32>
    %85 = vector.shape_cast %84 : vector<8xf32> to vector<8x1xf32>
    %86 = vector.broadcast %85 : vector<8x1xf32> to vector<8x8xf32>
    %87 = arith.subf %83, %86 : vector<8x8xf32>
    %88 = math.exp %87 : vector<8x8xf32>
    %cst_35 = arith.constant dense<0.000000e+00> : vector<8xf32>
    %89 = vector.multi_reduction <add>, %88, %cst_35 [1] : vector<8x8xf32> to vector<8xf32>
    %90 = vector.shape_cast %89 : vector<8xf32> to vector<8x1xf32>
    %cst_36 = arith.constant dense<0.000000e+00> : vector<8x4xf32>
    %91 = tpu.matmul %88, %82, %cst_36 {dimension_numbers = #tpu.dot_dimension_numbers<[1], [0], [0], [1], [0, 0, 1, 1], [], []>, precision = #tpu.contract_precision<fp32>} : vector<8x8xf32>, vector<8x4xf32>, vector<8x4xf32> -> vector<8x4xf32>
    %cst_37 = arith.constant 1.000000e+00 : f32
    %92 = vector.broadcast %cst_37 : f32 to vector<8x1xf32>
    %93 = arith.divf %92, %90 : vector<8x1xf32>
    %94 = vector.broadcast %93 : vector<8x1xf32> to vector<8x4xf32>
    %95 = arith.mulf %91, %94 : vector<8x4xf32>
    %96 = vector.extract_strided_slice %5 {offsets = [0, 20], sizes = [8, 4], strides = [1, 1]} : vector<8x96xf32> to vector<8x4xf32>
    %cst_38 = arith.constant 5.000000e-01 : f32
    %97 = vector.broadcast %cst_38 : f32 to vector<8x4xf32>
    %98 = arith.mulf %96, %97 : vector<8x4xf32>
    %99 = vector.extract_strided_slice %5 {offsets = [0, 52], sizes = [8, 4], strides = [1, 1]} : vector<8x96xf32> to vector<8x4xf32>
    %100 = vector.extract_strided_slice %5 {offsets = [0, 84], sizes = [8, 4], strides = [1, 1]} : vector<8x96xf32> to vector<8x4xf32>
    %cst_39 = arith.constant dense<0.000000e+00> : vector<8x8xf32>
    %101 = tpu.matmul %98, %99, %cst_39 {dimension_numbers = #tpu.dot_dimension_numbers<[1], [1], [0], [0], [0, 0, 1, 0], [], []>, precision = #tpu.contract_precision<fp32>} : vector<8x4xf32>, vector<8x4xf32>, vector<8x8xf32> -> vector<8x8xf32>
    %cst_40 = arith.constant dense<0xFF800000> : vector<8xf32>
    %102 = vector.multi_reduction <maximumf>, %101, %cst_40 [1] : vector<8x8xf32> to vector<8xf32>
    %103 = vector.shape_cast %102 : vector<8xf32> to vector<8x1xf32>
    %104 = vector.broadcast %103 : vector<8x1xf32> to vector<8x8xf32>
    %105 = arith.subf %101, %104 : vector<8x8xf32>
    %106 = math.exp %105 : vector<8x8xf32>
    %cst_41 = arith.constant dense<0.000000e+00> : vector<8xf32>
    %107 = vector.multi_reduction <add>, %106, %cst_41 [1] : vector<8x8xf32> to vector<8xf32>
    %108 = vector.shape_cast %107 : vector<8xf32> to vector<8x1xf32>
    %cst_42 = arith.constant dense<0.000000e+00> : vector<8x4xf32>
    %109 = tpu.matmul %106, %100, %cst_42 {dimension_numbers = #tpu.dot_dimension_numbers<[1], [0], [0], [1], [0, 0, 1, 1], [], []>, precision = #tpu.contract_precision<fp32>} : vector<8x8xf32>, vector<8x4xf32>, vector<8x4xf32> -> vector<8x4xf32>
    %cst_43 = arith.constant 1.000000e+00 : f32
    %110 = vector.broadcast %cst_43 : f32 to vector<8x1xf32>
    %111 = arith.divf %110, %108 : vector<8x1xf32>
    %112 = vector.broadcast %111 : vector<8x1xf32> to vector<8x4xf32>
    %113 = arith.mulf %109, %112 : vector<8x4xf32>
    %114 = vector.extract_strided_slice %5 {offsets = [0, 24], sizes = [8, 4], strides = [1, 1]} : vector<8x96xf32> to vector<8x4xf32>
    %cst_44 = arith.constant 5.000000e-01 : f32
    %115 = vector.broadcast %cst_44 : f32 to vector<8x4xf32>
    %116 = arith.mulf %114, %115 : vector<8x4xf32>
    %117 = vector.extract_strided_slice %5 {offsets = [0, 56], sizes = [8, 4], strides = [1, 1]} : vector<8x96xf32> to vector<8x4xf32>
    %118 = vector.extract_strided_slice %5 {offsets = [0, 88], sizes = [8, 4], strides = [1, 1]} : vector<8x96xf32> to vector<8x4xf32>
    %cst_45 = arith.constant dense<0.000000e+00> : vector<8x8xf32>
    %119 = tpu.matmul %116, %117, %cst_45 {dimension_numbers = #tpu.dot_dimension_numbers<[1], [1], [0], [0], [0, 0, 1, 0], [], []>, precision = #tpu.contract_precision<fp32>} : vector<8x4xf32>, vector<8x4xf32>, vector<8x8xf32> -> vector<8x8xf32>
    %cst_46 = arith.constant dense<0xFF800000> : vector<8xf32>
    %120 = vector.multi_reduction <maximumf>, %119, %cst_46 [1] : vector<8x8xf32> to vector<8xf32>
    %121 = vector.shape_cast %120 : vector<8xf32> to vector<8x1xf32>
    %122 = vector.broadcast %121 : vector<8x1xf32> to vector<8x8xf32>
    %123 = arith.subf %119, %122 : vector<8x8xf32>
    %124 = math.exp %123 : vector<8x8xf32>
    %cst_47 = arith.constant dense<0.000000e+00> : vector<8xf32>
    %125 = vector.multi_reduction <add>, %124, %cst_47 [1] : vector<8x8xf32> to vector<8xf32>
    %126 = vector.shape_cast %125 : vector<8xf32> to vector<8x1xf32>
    %cst_48 = arith.constant dense<0.000000e+00> : vector<8x4xf32>
    %127 = tpu.matmul %124, %118, %cst_48 {dimension_numbers = #tpu.dot_dimension_numbers<[1], [0], [0], [1], [0, 0, 1, 1], [], []>, precision = #tpu.contract_precision<fp32>} : vector<8x8xf32>, vector<8x4xf32>, vector<8x4xf32> -> vector<8x4xf32>
    %cst_49 = arith.constant 1.000000e+00 : f32
    %128 = vector.broadcast %cst_49 : f32 to vector<8x1xf32>
    %129 = arith.divf %128, %126 : vector<8x1xf32>
    %130 = vector.broadcast %129 : vector<8x1xf32> to vector<8x4xf32>
    %131 = arith.mulf %127, %130 : vector<8x4xf32>
    %132 = vector.extract_strided_slice %5 {offsets = [0, 28], sizes = [8, 4], strides = [1, 1]} : vector<8x96xf32> to vector<8x4xf32>
    %cst_50 = arith.constant 5.000000e-01 : f32
    %133 = vector.broadcast %cst_50 : f32 to vector<8x4xf32>
    %134 = arith.mulf %132, %133 : vector<8x4xf32>
    %135 = vector.extract_strided_slice %5 {offsets = [0, 60], sizes = [8, 4], strides = [1, 1]} : vector<8x96xf32> to vector<8x4xf32>
    %136 = vector.extract_strided_slice %5 {offsets = [0, 92], sizes = [8, 4], strides = [1, 1]} : vector<8x96xf32> to vector<8x4xf32>
    %cst_51 = arith.constant dense<0.000000e+00> : vector<8x8xf32>
    %137 = tpu.matmul %134, %135, %cst_51 {dimension_numbers = #tpu.dot_dimension_numbers<[1], [1], [0], [0], [0, 0, 1, 0], [], []>, precision = #tpu.contract_precision<fp32>} : vector<8x4xf32>, vector<8x4xf32>, vector<8x8xf32> -> vector<8x8xf32>
    %cst_52 = arith.constant dense<0xFF800000> : vector<8xf32>
    %138 = vector.multi_reduction <maximumf>, %137, %cst_52 [1] : vector<8x8xf32> to vector<8xf32>
    %139 = vector.shape_cast %138 : vector<8xf32> to vector<8x1xf32>
    %140 = vector.broadcast %139 : vector<8x1xf32> to vector<8x8xf32>
    %141 = arith.subf %137, %140 : vector<8x8xf32>
    %142 = math.exp %141 : vector<8x8xf32>
    %cst_53 = arith.constant dense<0.000000e+00> : vector<8xf32>
    %143 = vector.multi_reduction <add>, %142, %cst_53 [1] : vector<8x8xf32> to vector<8xf32>
    %144 = vector.shape_cast %143 : vector<8xf32> to vector<8x1xf32>
    %cst_54 = arith.constant dense<0.000000e+00> : vector<8x4xf32>
    %145 = tpu.matmul %142, %136, %cst_54 {dimension_numbers = #tpu.dot_dimension_numbers<[1], [0], [0], [1], [0, 0, 1, 1], [], []>, precision = #tpu.contract_precision<fp32>} : vector<8x8xf32>, vector<8x4xf32>, vector<8x4xf32> -> vector<8x4xf32>
    %cst_55 = arith.constant 1.000000e+00 : f32
    %146 = vector.broadcast %cst_55 : f32 to vector<8x1xf32>
    %147 = arith.divf %146, %144 : vector<8x1xf32>
    %148 = vector.broadcast %147 : vector<8x1xf32> to vector<8x4xf32>
    %149 = arith.mulf %145, %148 : vector<8x4xf32>
    %150 = tpu.concatenate %23, %41, %59, %77, %95, %113, %131, %149 in 1 : vector<8x4xf32>, vector<8x4xf32>, vector<8x4xf32>, vector<8x4xf32>, vector<8x4xf32>, vector<8x4xf32>, vector<8x4xf32>, vector<8x4xf32> -> vector<8x32xf32>
    %cst_56 = arith.constant dense<0.000000e+00> : vector<8x32xf32>
    %151 = tpu.matmul %150, %1, %cst_56 {dimension_numbers = #tpu.dot_dimension_numbers<[1], [0], [0], [1], [0, 0, 1, 1], [], []>, precision = #tpu.contract_precision<fp32>} : vector<8x32xf32>, vector<32x32xf32>, vector<8x32xf32> -> vector<8x32xf32>
    %152 = vector.broadcast %2 : vector<1x32xf32> to vector<8x32xf32>
    %153 = arith.addf %151, %152 : vector<8x32xf32>
    %c0_57 = arith.constant 0 : index
    %c0_58 = arith.constant 0 : index
    %c0_59 = arith.constant 0 : index
    %154 = vector.load %arg5[%c0_57, %c0_58, %c0_59] : memref<1x8x32xf32, #tpu.memory_space<vmem>>, vector<1x8x32xf32>
    %155 = vector.shape_cast %154 : vector<1x8x32xf32> to vector<8x32xf32>
    %156 = vector.shape_cast %153 : vector<8x32xf32> to vector<1x8x32xf32>
    tpu.vector_store %arg5[%c0_57, %c0_58, %c0_59], %156 {strides = array<i32>} : memref<1x8x32xf32, #tpu.memory_space<vmem>>, vector<1x8x32xf32>,
    return
  }
  func.func @transform_0(%arg0: i32) -> (i32, i32, i32) {
    %c0_i32 = arith.constant 0 : i32
    %c0_i32_0 = arith.constant 0 : i32
    %c0_i32_1 = arith.constant 0 : i32
    return %arg0, %c0_i32, %c0_i32_0 : i32, i32, i32
  }
  func.func @transform_1(%arg0: i32) -> (i32, i32) {
    %c0_i32 = arith.constant 0 : i32
    %c0_i32_0 = arith.constant 0 : i32
    %c0_i32_1 = arith.constant 0 : i32
    return %c0_i32, %c0_i32_0 : i32, i32
  }
  func.func @transform_2(%arg0: i32) -> (i32, i32) {
    %c0_i32 = arith.constant 0 : i32
    %c0_i32_0 = arith.constant 0 : i32
    %c0_i32_1 = arith.constant 0 : i32
    return %c0_i32, %c0_i32_0 : i32, i32
  }
  func.func @transform_3(%arg0: i32) -> (i32, i32) {
    %c0_i32 = arith.constant 0 : i32
    %c0_i32_0 = arith.constant 0 : i32
    %c0_i32_1 = arith.constant 0 : i32
    return %c0_i32, %c0_i32_0 : i32, i32
  }
  func.func @transform_4(%arg0: i32) -> (i32, i32, i32) {
    %c0_i32 = arith.constant 0 : i32
    %c0_i32_0 = arith.constant 0 : i32
    %c0_i32_1 = arith.constant 0 : i32
    return %arg0, %c0_i32, %c0_i32_0 : i32, i32, i32
  }
}

</mosaic_0001>

<bundles_post_ra>
// kernel: tpu_custom_call.1
= control target key start
LH: loop header
LB: loop body
LE: loop exit
PB: predicated region body
PF: predicated region fallthrough
CT: control target
= control target key end

     0   :  { %9 = vsyncpa [#allocation3], 0  ;;  %s10985_s0 = inlined_call_operand.hbm [shape: f32[2,8,32], index: 0, kind: input, shape index: {}]   ;;  %s10986_s1 = inlined_call_operand.hbm [shape: f32[32,96], index: 1, kind: input, shape index: {}]   ;;  %s10987_s2 = inlined_call_operand.hbm [shape: f32[32,32], index: 2, kind: input, shape index: {}]   ;;  %s10988_s3 = inlined_call_operand.vmem [shape: f32[1,32], index: 3, kind: input, shape index: {}]   ;;  %s10989_s4 = inlined_call_operand.hbm [shape: f32[2,8,32], index: 4, kind: output, shape index: {}]  }
   0x1   :  { %11 = vsyncpa [#allocation3 + $0x1], 0 }
   0x2   :  { %12 = vsyncpa [#allocation6], 0 }
   0x3   :  { %13 = vsyncpa [#allocation4], 0 }
   0x4   :  { %15 = vsyncpa [#allocation4 + $0x1], 0  ;;  %s10215_s15 = smov 0   ;;  %s10217_s16 = smov 0  }
   0x5   :  { %s10219_s17 = smov 0   ;;  %s10221_s18 = smov 0  }
   0x6 LB: > { %s10236_s19 = sadd.s32 4294967295, %s10149_s18   ;;  %s8726_s20 = sadd.s32 4294967294, %s10149_s18   ;;  %s10149_s18 = sphi %s10221_s18, %s11009_s18   ;;  %s10145_s17 = sphi %s10219_s17, %s11008_s17   ;;  %s10141_s16 = sphi %s10217_s16, %s11007_s16   ;;  %s10137_s15 = sphi %s10215_s15, %s11006_s15  }
   0x7   : > { %p41_p0 = scmp.ne.s32.totalorder %s10141_s16, %s10137_s15  ;;  %p10990_p1 = scmp.eq.s32.totalorder %s10236_s19, 0 }
   0x8   : > { %p134_p3 = scmp.eq.s32.totalorder %s8726_s20, 1  ;;  %p8727_p5 = scmp.ge.s32.totalorder %s10149_s18, 1 }
   0x9   : > { %p10245_p4 = por %p10990_p1, %p41_p0  ;;  %p141_p7 = scmp.lt.s32.totalorder %s10149_s18, 3 }
   0xa   : > { %p10250_p6 = por %p134_p3, %p41_p0  ;;  %s10151_s24 = smov [#allocation5]  }
   0xb   : > { %s10993_s21 = scalar_select %p10245_p4, 1, 0 }
   0xc   : > { %s10994_s22 = scalar_select %p10250_p6, 1, 0 }
   0xd   : > { %p10255_p8 = pnand %p8727_p5, %p141_p7  ;;  %s153_s25 = sshll.u32 %s10151_s24, 4  ;;  %s10259_s25 = int_to_ptr.vmem [resolvable:$true] %s153_s25 }
   0xe   : > { %s10152_s27 = smov [#allocation7]   ;;  %s9993_s5 = scalar_lea.hbm %s10986_s1, 512 }
   0xf   : > { %p9871_p9 = pneg %p10255_p8  ;;  %s166_s28 = sshll.u32 %s10152_s27, 4  ;;  %s10270_s28 = int_to_ptr.vmem [resolvable:$true] %s166_s28 }
  0x10   : > { %p9994_p12 = scmp.ne.s32.totalorder %s10986_s1, %s9993_s5  ;;  %p10000_p5 = scmp.lt.u32.totalorder %s9993_s5, %s10986_s1 }
  0x11   : > { %p10266_p11 = pnand %p9871_p9, %p10990_p1 }
  0x13   : > { %p9995_p13 = pneg %p10266_p11 }
  0x15   : > { %p9996_p0 = pnand %p9995_p13, %p9994_p12 }
  0x17   : > { %p9997_p3 = pneg %p9996_p0 }
  0x19   : > { %p10002_p7 = pnand %p10000_p5, %p9997_p3 }
  0x1b   : > { %10005 = shalt.err (!%p10002_p7)
}
  0x1c   : > { %s10006_s10 = scalar_lea.vmem %s10259_s25, 512  ;;  %p10014_p2 = scmp.lt.s32.totalorder %s10259_s25, %s10259_s25 }
  0x1d   : > { %p10007_p9 = scmp.ne.s32.totalorder %s10259_s25, %s10006_s10  ;;  %p10015_p12 = scmp.lt.s32.totalorder %s10006_s10, %s10006_s10 }
  0x1f   : > { %p10009_p10 = pnand %p10007_p9, %p9995_p13  ;;  %p10016_p0 = por %p10015_p12, %p10014_p2 }
  0x21   : > { %p10010_p1 = pneg %p10009_p10 }
  0x23   : > { %p10017_p6 = pnand %p10016_p0, %p10010_p1 }
  0x25   : > { %10020 = shalt.err (!%p10017_p6)
}
  0x26   : > { %s10153_s11 = smov 128   ;;  %s10154_s12 = smov 8  }
  0x27   : > { %9874 = dma.hbm_to_vmem [thread:$0]  (!%p10266_p11), %s10986_s1, 512, %s10259_s25, [#allocation6], %s10153_s11, %s10153_s11, %s10154_s12  }
  0x28   : > { %s10021_s27 = scalar_lea.hbm %s10987_s2, 512 }
  0x29   : > { %p10022_p2 = scmp.ne.s32.totalorder %s10987_s2, %s10021_s27  ;;  %p10028_p10 = scmp.lt.u32.totalorder %s10021_s27, %s10987_s2 }
  0x2b   : > { %p10024_p1 = pnand %p10022_p2, %p9995_p13 }
  0x2d   : > { %p10025_p6 = pneg %p10024_p1 }
  0x2f   : > { %p10030_p3 = pnand %p10028_p10, %p10025_p6 }
  0x31   : > { %10033 = shalt.err (!%p10030_p3)
}
  0x32   : > { %s10034_s25 = scalar_lea.vmem %s10270_s28, 512  ;;  %p10042_p12 = scmp.lt.s32.totalorder %s10270_s28, %s10270_s28 }
  0x33   : > { %p10035_p5 = scmp.ne.s32.totalorder %s10270_s28, %s10034_s25  ;;  %p10043_p0 = scmp.lt.s32.totalorder %s10034_s25, %s10034_s25 }
  0x35   : > { %p10037_p7 = pnand %p10035_p5, %p9995_p13  ;;  %p10044_p2 = por %p10043_p0, %p10042_p12 }
  0x37   : > { %p10038_p9 = pneg %p10037_p7 }
  0x39   : > { %p10045_p1 = pnand %p10044_p2, %p10038_p9 }
  0x3b   : > { %10048 = shalt.err (!%p10045_p1)
}
  0x3c   : > { %9877 = dma.hbm_to_vmem [thread:$0]  (!%p10266_p11), %s10987_s2, 512, %s10270_s28, [#allocation6], %s10153_s11, %s10153_s11, %s10154_s12  }
  0x3d   : > { %s10325_s9 = sadd.s32 1, %s10149_s18   ;;  %s28_s26 = sadd.s32 1, %s10145_s17 }
  0x3e   : > { %s25_s10 = ssub.s32 %s10149_s18, %s10325_s9  ;;  %p35_p13 = scmp.ne.s32.totalorder %s10145_s17, %s10141_s16 }
  0x3f   : > { %p26_p6 = scmp.eq.s32.totalorder %s25_s10, 0  ;;  %p36_p10 = scmp.eq.s32.totalorder %s10149_s18, 0 }
  0x40   : > { %p10997_p3 = scmp.eq.s32.totalorder %s10236_s19, 1  ;;  %p9888_p7 = scmp.lt.s32.totalorder %s10149_s18, 2 }
  0x41   : > { %s10341_s14 = scalar_select %p26_p6, %s10145_s17, %s28_s26  }
  0x42   : > { %p10335_p5 = por %p10997_p3, %p35_p13  ;;  %p37_p9 = por %p36_p10, %p35_p13 }
  0x43   : > { %s183_s20 = sand.u32 1, %s10145_s17   ;;  %s8732_s28 = sshll.u32 %s10149_s18, 7 }
  0x44   : > { %s10998_s13 = scalar_select %p10335_p5, 1, 0 }
  0x45   : > { %s8731_s24 = sshll.u32 %s183_s20, 3  ;;  %s10348_s27 = scalar_lea.hbm %s10985_s0, %s8732_s28 }
  0x46   : > { %s187_s29 = scalar_lea.vmem [#allocation2], %s8731_s24  ;;  %p10352_p11 = pnand %p9888_p7, %p37_p9 }
  0x47   : > { %s194_s30 = sshll.u32 %s187_s29, 4  ;;  %s184_s6 = scalar_lea.sflag [#allocation3], %s183_s20  ;;  %s10350_s30 = int_to_ptr.vmem [resolvable:$true] %s194_s30 }
  0x48   : > { %s10049_s25 = scalar_lea.hbm %s10348_s27, 128  ;;  %p10051_p0 = pneg %p10352_p11 }
  0x49   : > { %p10050_p12 = scmp.ne.s32.totalorder %s10348_s27, %s10049_s25  ;;  %s10054_s26 = scalar_lea.hbm %s10985_s0, 256 }
  0x4a   : > { %p10055_p13 = scmp.lt.u32.totalorder %s10348_s27, %s10985_s0  ;;  %p10056_p6 = scmp.lt.u32.totalorder %s10054_s26, %s10049_s25 }
  0x4b   : > { %p10052_p2 = pnand %p10051_p0, %p10050_p12  ;;  %p10058_p3 = scmp.lt.u32.totalorder %s10049_s25, %s10348_s27 }
  0x4c   : > { %p10057_p10 = por %p10056_p6, %p10055_p13 }
  0x4d   : > { %p10053_p1 = pneg %p10052_p2 }
  0x4e   : > { %p10059_p7 = por %p10058_p3, %p10057_p10 }
  0x50   : > { %p10060_p9 = pnand %p10059_p7, %p10053_p1 }
  0x52   : > { %10063 = shalt.err (!%p10060_p9)
}
  0x53   : > { %s10064_s20 = scalar_lea.vmem %s10350_s30, 128  ;;  %s10155_s28 = smov [#allocation2]  }
  0x54   : > { %p10065_p12 = scmp.ne.s32.totalorder %s10350_s30, %s10064_s20  ;;  %s10069_s11 = sshll.u32 %s10155_s28, 4  ;;  %s10070_s11 = int_to_ptr.vmem [resolvable:$false] %s10069_s11 }
  0x55   : > { %s10071_s12 = scalar_lea.vmem %s10070_s11, 256  ;;  %p10072_p4 = scmp.lt.s32.totalorder %s10350_s30, %s10070_s11 }
  0x56   : > { %p10067_p2 = pnand %p10065_p12, %p10051_p0  ;;  %p10073_p13 = scmp.lt.s32.totalorder %s10071_s12, %s10064_s20 }
  0x58   : > { %p10068_p5 = pneg %p10067_p2  ;;  %p10074_p6 = por %p10073_p13, %p10072_p4 }
  0x5a   : > { %p10075_p10 = pnand %p10074_p6, %p10068_p5 }
  0x5c   : > { %10078 = shalt.err (!%p10075_p10)
}
  0x5d   : > { %9881 = dma.hbm_to_vmem [thread:$0]  (!%p10352_p11), %s10348_s27, 128, %s10350_s30, %s184_s6  }
  0x5e   : > { %203 = sbr.rel (%p10255_p8) target bundleno = 1848 (0x738), region = 36  ;;  %s10384_s29 = sand.u32 (!%p10255_p8), 1, %s10141_s16  }
  0x5f   : > { %s8734_s25 = sshll.u32 (!%p10255_p8), %s10384_s29, 3  ;;  %s206_s7 = scalar_lea.sflag (!%p10255_p8), [#allocation3], %s10384_s29 }
  0x60   : > { %s209_s8 = scalar_lea.vmem (!%p10255_p8), [#allocation2], %s8734_s25  ;;  %p11000_p4 = scmp.ne.s32.totalorder (!%p10255_p8), %s10993_s21, 0 }
  0x65   : > { %10124 = dma.done.wait (%p11000_p4), %s206_s7, 128  }
  0x66   : > { %10126 = vsyncadd (%p11000_p4), %s206_s7, 4294967168  ;;  %p11001_p5 = scmp.eq.s32.totalorder %s10236_s19, 0 }
  0x68   : > { %10128 = dma.done.wait (%p11001_p5), [#allocation6], 1024   ;;  %p11002_p8 = pmov %p11001_p5 }
  0x69   : > { %v10156_v0 = vmov 0.0|0.0   ;;  %vm10157_vm0 = vmmov 0   ;;  %v10158_v1 = vmov 0.0   ;;  %vm252_vm1 = vcmask 261120   ;;  %v242_v2 = vld [vmem:[#allocation5] sm:$0xff]  ;;  %v243_v3 = vld [vmem:[#allocation5 + $0x8] sm:$0xff] }
  0x6a   : > { %10130 = vsyncadd (%p11002_p8), [#allocation6], 4294966272  ;;  %9607 = vmatprep.subr.bf16.mxu1 %v10156_v0  ;;  %9625 = vmatprep.subr.bf16.mxu0 %v10156_v0  ;;  %v244_v4 = vld [vmem:[#allocation5 + $0x10] sm:$0xff]  ;;  %v257_v5 = vand.u32 4294901760, %v242_v2  ;;  %v260_v6 = vand.u32 4294901760, %v243_v3  ;;  %v245_v7 = vld [vmem:[#allocation5 + $0x18] sm:$0xff] }
  0x6b   : > { %9003 = vmatprep.mubr.msk.f32.mxu1 %vm10157_vm0, %v10158_v1  ;;  %9036 = vmatprep.mubr.msk.f32.mxu0 %vm10157_vm0, %v10158_v1  ;;  %v263_v8 = vand.u32 4294901760, %v244_v4  ;;  %v251_v9 = vld [vmem:[%s209_s8] sm:$0xff]  ;;  %v266_v10 = vand.u32 4294901760, %v245_v7  ;;  %s10159_s21 = smov 92   ;;  %s10160_s23 = smov 96   ;;  %vm745_vm2 = vcmask 31744  }
  0x6c   : > { %v254_v11 = vsel %vm252_vm1, %v251_v9, 0  ;;  %v9608_v12 = vpack.c.bf16 %v260_v6, %v257_v5  ;;  %v337_v13 = vsub.f32 %v242_v2, %v257_v5  ;;  %v344_v14 = vsub.f32 %v243_v3, %v260_v6  ;;  %s10161_s27 = smov 120   ;;  %s10162_s30 = smov 124  }
  0x6d   : > { %v351_v15 = vsub.f32 %v244_v4, %v263_v8  ;;  %v358_v16 = vsub.f32 %v245_v7, %v266_v10  ;;  %v325_v17 = vand.u32 4294901760, %v254_v11  ;;  %v9611_v18 = vpack.c.bf16 %v266_v10, %v263_v8  ;;  %s10163_s5 = smov 116   ;;  %s10164_s6 = smov 88  }
  0x6e   : > { %9609 = vmatpush3.bf16.msra.mxu1 %v9608_v12  ;;  %9627 = vmatpush3.bf16.msra.mxu0 %v9608_v12  ;;  %v338_v19 = vand.u32 4294901760, %v337_v13  ;;  %v345_v20 = vand.u32 4294901760, %v344_v14  ;;  %v9620_v39 = vpack.c.bf16 %v344_v14, %v337_v13  ;;  %s10165_s26 = smov 112   ;;  %s10166_s10 = smov 84   ;;  %vm1197_vm3 = vcmask 64512  }
  0x6f   : > { %v352_v21 = vand.u32 4294901760, %v351_v15  ;;  %9610 = vmatprep.subr.bf16.mxu1 %v10156_v0  ;;  %9628 = vmatprep.subr.bf16.mxu0 %v10156_v0  ;;  %v326_v22 = vsub.f32 %v254_v11, %v325_v17  ;;  %v359_v23 = vand.u32 4294901760, %v358_v16  ;;  %v9623_v40 = vpack.c.bf16 %v358_v16, %v351_v15  ;;  %s10167_s24 = smov 108   ;;  %s10168_s20 = smov 80  }
  0x70   : > { %v339_v24 = vsub.f32 %v337_v13, %v338_v19  ;;  %v346_v25 = vsub.f32 %v344_v14, %v345_v20  ;;  %v9632_v31 = vpack.c.bf16 %v345_v20, %v338_v19  ;;  %s10169_s28 = smov 104   ;;  %s10170_s11 = smov 76   ;;  %vm8118_vm4 = vcmask 97280  }
  0x71   : > { %v353_v26 = vsub.f32 %v351_v15, %v352_v21  ;;  %v327_v27 = vand.u32 4294901760, %v326_v22  ;;  %v360_v28 = vsub.f32 %v358_v16, %v359_v23  ;;  %v9635_v37 = vpack.c.bf16 %v359_v23, %v352_v21  ;;  %s10171_s12 = smov 100   ;;  %s10172_s7 = smov 72  }
  0x72   : > { %9612 = vmatpush3.bf16.msra.mxu1 %v9611_v18  ;;  %9630 = vmatpush3.bf16.msra.mxu0 %v9611_v18  ;;  %v340_v29 = vand.u32 4294901760, %v339_v24  ;;  %v347_v30 = vand.u32 4294901760, %v346_v25  ;;  %s10173_s8 = smov 68   ;;  %vm8120_vm5 = vcmask 130048   ;;  %vm8122_vm6 = vcmask 162816   ;;  %p11003_p0 = scmp.ne.s32.totalorder %s10998_s13, 0 }
  0x73   : > { %v328_v32 = vsub.f32 %v326_v22, %v327_v27  ;;  %9613 = vmatprep.subr.bf16.mxu1 %v10156_v0  ;;  %9631 = vmatprep.subr.bf16.mxu0 %v10156_v0  ;;  %v354_v34 = vand.u32 4294901760, %v353_v26  ;;  %v361_v35 = vand.u32 4294901760, %v360_v28  ;;  %vm8124_vm7 = vcmask 195584  }
  0x74   : > { %v9614_v33 = vpack.c.bf16 %v347_v30, %v340_v29  ;;  %vm8126_vm8 = vcmask 228352  }
  0x75   : > { %v329_v36 = vand.u32 4294901760, %v328_v32  ;;  %9037 = vmatmul.mubr.f32.vlgmr.msra.gmra.mrb[0].mxu0 %v327_v27  ;;  %v9617_v38 = vpack.c.bf16 %v361_v35, %v354_v34 }
  0x76   : > { %9633 = vmatpush3.bf16.msra.mxu0 %v9632_v31  ;;  %9047 = vmatprep.mubr.msk.f32.mxu0 %vm10157_vm0, %v10158_v1 }
  0x77   : > { %9004 = vmatmul.mubr.f32.vlgmr.msra.gmra.mrb[0].mxu1 %v329_v36  ;;  %9634 = vmatprep.subr.bf16.mxu0 %v10156_v0 }
  0x78   : > { %9615 = vmatpush3.bf16.msra.mxu1 %v9614_v33  ;;  %9014 = vmatprep.mubr.msk.f32.mxu1 %vm10157_vm0, %v10158_v1 }
  0x79   : > { %9616 = vmatprep.subr.bf16.mxu1 %v10156_v0 }
  0x7a   : > { %9636 = vmatpush3.bf16.msra.mxu0 %v9635_v37 }
  0x7b   : > { %9637 = vmatprep.subr.bf16.mxu0 %v10156_v0 }
  0x7c   : > { %9618 = vmatpush3.bf16.msra.mxu1 %v9617_v38 }
  0x7d   : > { %9619 = vmatprep.subr.bf16.mxu1 %v10156_v0  ;;  %9048 = vmatmul.mubr.f32.vlgmr.msra.gmra.mrb[0].mxu0 %v325_v17 }
  0x7e   : > { %9639 = vmatpush3.bf16.msra.mxu0 %v9608_v12  ;;  %9058 = vmatprep.mubr.msk.f32.mxu0 %vm10157_vm0, %v10158_v1 }
  0x7f   : > { %9015 = vmatmul.mubr.f32.vlgmr.msra.gmra.mrb[0].mxu1 %v325_v17  ;;  %9640 = vmatprep.subr.bf16.mxu0 %v10156_v0 }
  0x80   : > { %9621 = vmatpush3.bf16.msra.mxu1 %v9620_v39  ;;  %9025 = vmatprep.mubr.msk.f32.mxu1 %vm10157_vm0, %v10158_v1 }
  0x81   : > { %9622 = vmatprep.subr.bf16.mxu1 %v10156_v0 }
  0x82   : > { %9642 = vmatpush3.bf16.msra.mxu0 %v9611_v18 }
  0x83   : > { %9121 = vmatprep.subr.mxu0 %v10158_v1 }
  0x84   : > { %9624 = vmatpush3.bf16.msra.mxu1 %v9623_v40 }
  0x85   : > { %9059 = vmatmul.mubr.f32.vlgmr.msra.gmra.mrb[0].mxu0 %v325_v17  ;;  %9061 = vmatprep.subr.mxu1 %v10158_v1 }
  0x86   : > { %9123 = vmatprep.mubr.msk.f32.mxu0 %vm10157_vm0, %v10158_v1 }
  0x87   : > { %9026 = vmatmul.mubr.f32.vlgmr.msra.gmra.mrb[0].mxu1 %v326_v22 }
  0x88   : > { %9063 = vmatprep.mubr.msk.f32.mxu1 %vm10157_vm0, %v10158_v1 }
 0x158   : > { %v737_v41 = vpop.f32.mrb[0].mxu0 }
 0x159   : > { %v9060_v42 = vpop.f32.mrb[1].mxu0 }
 0x15a   : > { %v502_v43 = vpop.f32.mrb[0].mxu1 }
 0x15b   : > { %v10429_v44 = vadd.f32 %v737_v41, %v502_v43  ;;  %v9027_v45 = vpop.f32.mrb[1].mxu1 }
 0x15d   : > { %1664 = vrot.lane.b32.xlu1 %v10429_v44, %s10159_s21  ;;  %743 = vrot.lane.b32.xlu0 %v10429_v44, %s10160_s23  ;;  %v741_v46 = vmul.f32 0.5, %v10429_v44  ;;  %s10174_s21 = smov 64   ;;  %s10175_s23 = smov 60  }
 0x15f   : > { %v747_v47 = vsel %vm745_vm2, %v741_v46, 0 }
 0x160   : > { %v10442_v48 = vand.u32 4294901760, %v747_v47 }
 0x161   : > { %2580 = vrot.lane.b32.xlu1 %v741_v46, %s10161_s27  ;;  %1662 = vrot.lane.b32.xlu0 %v741_v46, %s10162_s30  ;;  %s10176_s27 = smov 56   ;;  %s10177_s30 = smov 52  }
 0x162   : > { %v818_v49 = vsub.f32 %v747_v47, %v10442_v48 }
 0x164   : > { %v819_v50 = vand.u32 4294901760, %v818_v49 }
 0x165   : > { %3498 = vrot.lane.b32.xlu1 %v741_v46, %s10163_s5  ;;  %2582 = vrot.lane.b32.xlu0 %v10429_v44, %s10164_s6  ;;  %s10178_s5 = smov 48   ;;  %s10179_s6 = smov 44  }
 0x166   : > { %v820_v55 = vsub.f32 %v818_v49, %v819_v50 }
 0x168   : > { %v821_v62 = vand.u32 4294901760, %v820_v55 }
 0x169   : > { %4416 = vrot.lane.b32.xlu1 %v741_v46, %s10165_s26  ;;  %3500 = vrot.lane.b32.xlu0 %v10429_v44, %s10166_s10  ;;  %s10180_s26 = smov 40   ;;  %s10181_s10 = smov 36  }
 0x16d   : > { %5334 = vrot.lane.b32.xlu1 %v741_v46, %s10167_s24  ;;  %4418 = vrot.lane.b32.xlu0 %v10429_v44, %s10168_s20  ;;  %s10182_s24 = smov 4   ;;  %s10183_s20 = smov 8  }
 0x171   : > { %6252 = vrot.lane.b32.xlu1 %v741_v46, %s10169_s28  ;;  %5336 = vrot.lane.b32.xlu0 %v10429_v44, %s10170_s11  ;;  %s10184_s28 = smov 12   ;;  %s10185_s11 = smov 16  }
 0x175   : > { %7170 = vrot.lane.b32.xlu1 %v741_v46, %s10171_s12  ;;  %6254 = vrot.lane.b32.xlu0 %v10429_v44, %s10172_s7  ;;  %s10186_s12 = smov 20   ;;  %s10187_s7 = smov 24  }
 0x179   : > { %7172 = vrot.lane.b32.xlu0 %v10429_v44, %s10173_s8  ;;  %s10188_s8 = smov 28  }
 0x17d   : > { %1207 = vrot.lane.b32.xlu0 %v10429_v44, %s10174_s21 }
 0x1cf   : > { %v1665_v51 = vpop.permute.xlu1 %1664  ;;  %v744_v52 = vpop.permute.xlu0 %743 }
 0x1d0   : > { %v1668_v53 = vsel %vm745_vm2, %v1665_v51, 0  ;;  %v749_v54 = vsel %vm745_vm2, %v744_v52, 0 }
 0x1d1   : > { %v10447_v56 = vand.u32 4294901760, %v1668_v53  ;;  %v752_v57 = vand.u32 4294901760, %v749_v54 }
 0x1d3   : > { %v1748_v58 = vsub.f32 %v1668_v53, %v10447_v56  ;;  %v829_v59 = vsub.f32 %v749_v54, %v752_v57  ;;  %9062 = vmatpush3.xpose.msra.mxu1 %v752_v57  ;;  %9122 = vmatpush3.xpose.msra.mxu0 %v10447_v56  ;;  %v1663_v60 = vpop.permute.xlu0 %1662  ;;  %v2581_v17 = vpop.permute.xlu1 %2580 }
 0x1d4   : > { %v1666_v61 = vsel %vm745_vm2, %v1663_v60, 0  ;;  %9066 = vmatprep.subr.mxu1 %v10158_v1  ;;  %9126 = vmatprep.subr.mxu0 %v10158_v1  ;;  %v2584_v19 = vsel %vm745_vm2, %v2581_v17, 0 }
 0x1d5   : > { %v830_v63 = vand.u32 4294901760, %v829_v59  ;;  %v10454_v2 = vand.u32 4294901760, %v1666_v61  ;;  %v1749_v3 = vand.u32 4294901760, %v1748_v58  ;;  %v2654_v21 = vand.u32 4294901760, %v2584_v19 }
 0x1d6   : > { %9064 = vmatmul.mubr.f32.vlgmr.msra.gmra.mrb[2].mxu1 %v821_v62 }
 0x1d7   : > { %v831_v4 = vsub.f32 %v829_v59, %v830_v63  ;;  %v1737_v5 = vsub.f32 %v1666_v61, %v10454_v2  ;;  %v2583_v6 = vpop.permute.xlu0 %2582  ;;  %9068 = vmatprep.mubr.msk.f32.mxu1 %vm10157_vm0, %v10158_v1  ;;  %v1750_v9 = vsub.f32 %v1748_v58, %v1749_v3  ;;  %v2655_v24 = vsub.f32 %v2584_v19, %v2654_v21  ;;  %v3499_v33 = vpop.permute.xlu1 %3498 }
 0x1d8   : > { %v2586_v20 = vsel %vm745_vm2, %v2583_v6, 0  ;;  %v3502_v34 = vsel %vm745_vm2, %v3499_v33, 0 }
 0x1d9   : > { %v832_v7 = vand.u32 4294901760, %v831_v4  ;;  %v1738_v8 = vand.u32 4294901760, %v1737_v5  ;;  %v1751_v13 = vand.u32 4294901760, %v1750_v9  ;;  %v2589_v22 = vand.u32 4294901760, %v2586_v20 }
 0x1da   : > { %v2656_v27 = vand.u32 4294901760, %v2655_v24  ;;  %v3572_v36 = vand.u32 4294901760, %v3502_v34 }
 0x1db   : > { %v1739_v10 = vsub.f32 %v1737_v5, %v1738_v8  ;;  %9067 = vmatpush3.xpose.msra.mxu1 %v832_v7  ;;  %v10459_v11 = vpop.permute.xlu0 %3500  ;;  %v2666_v26 = vsub.f32 %v2586_v20, %v2589_v22  ;;  %v4417_v47 = vpop.permute.xlu1 %4416 }
 0x1dc   : > { %9071 = vmatprep.subr.mxu1 %v10158_v1  ;;  %v2657_v29 = vsub.f32 %v2655_v24, %v2656_v27  ;;  %v3504_v35 = vsel %vm745_vm2, %v10459_v11, 0  ;;  %v3573_v38 = vsub.f32 %v3502_v34, %v3572_v36 }
 0x1dd   : > { %v1740_v12 = vand.u32 4294901760, %v1739_v10  ;;  %v2667_v28 = vand.u32 4294901760, %v2666_v26  ;;  %v3507_v37 = vand.u32 4294901760, %v3504_v35 }
 0x1de   : > { %9069 = vmatmul.mubr.f32.vlgmr.msra.gmra.mrb[2].mxu1 %v10442_v48  ;;  %v2658_v31 = vand.u32 4294901760, %v2657_v29  ;;  %v3574_v40 = vand.u32 4294901760, %v3573_v38 }
 0x1df   : > { %9124 = vmatmul.mubr.f32.vlgmr.msra.gmra.mrb[2].mxu0 %v1740_v12  ;;  %9072 = vmatpush3.xpose.msra.mxu1 %v829_v59  ;;  %v10468_v14 = vpop.permute.xlu0 %4418  ;;  %v2668_v30 = vsub.f32 %v2666_v26, %v2667_v28  ;;  %v3584_v39 = vsub.f32 %v3504_v35, %v3507_v37  ;;  %v5335_v60 = vpop.permute.xlu1 %5334 }
 0x1e0   : > { %9127 = vmatpush3.xpose.msra.mxu0 %v1751_v13  ;;  %9073 = vmatprep.mubr.msk.f32.mxu1 %vm10157_vm0, %v10158_v1  ;;  %v3575_v42 = vsub.f32 %v3573_v38, %v3574_v40  ;;  %v5338_v61 = vsel %vm745_vm2, %v5335_v60, 0 }
 0x1e1   : > { %9076 = vmatprep.subr.mxu1 %v10158_v1  ;;  %9128 = vmatprep.mubr.msk.f32.mxu0 %vm10157_vm0, %v10158_v1  ;;  %v2669_v32 = vand.u32 4294901760, %v2668_v30  ;;  %v3585_v41 = vand.u32 4294901760, %v3584_v39 }
 0x1e2   : > { %9131 = vmatprep.subr.mxu0 %v10158_v1  ;;  %v3576_v45 = vand.u32 4294901760, %v3575_v42 }
 0x1e3   : > { %v10472_v15 = vpop.permute.xlu0 %5336  ;;  %v3586_v43 = vsub.f32 %v3584_v39, %v3585_v41  ;;  %v6253_v11 = vpop.permute.xlu1 %6252 }
 0x1e4   : > { %v5340_v62 = vsel %vm745_vm2, %v10472_v15, 0  ;;  %v6256_v12 = vsel %vm745_vm2, %v6253_v11, 0 }
 0x1e5   : > { %v3587_v46 = vand.u32 4294901760, %v3586_v43 }
 0x1e6   : > { %9074 = vmatmul.mubr.f32.vlgmr.msra.gmra.mrb[2].mxu1 %v818_v49  ;;  %v4422_v49 = vsel %vm745_vm2, %v10468_v14, 0  ;;  %v6326_v14 = vand.u32 4294901760, %v6256_v12 }
 0x1e7   : > { %9077 = vmatpush3.xpose.msra.mxu1 %v752_v57  ;;  %9129 = vmatmul.mubr.f32.vlgmr.msra.gmra.mrb[2].mxu0 %v10454_v2  ;;  %v10480_v16 = vpop.permute.xlu0 %6254  ;;  %v4425_v51 = vand.u32 4294901760, %v4422_v49 }
 0x1e8   : > { %9132 = vmatpush3.xpose.msra.mxu0 %v1748_v58  ;;  %9078 = vmatprep.mubr.msk.f32.mxu1 %vm10157_vm0, %v10158_v1  ;;  %v6258_v13 = vsel %vm745_vm2, %v10480_v16, 0  ;;  %v6327_v17 = vsub.f32 %v6256_v12, %v6326_v14 }
 0x1e9   : > { %9081 = vmatprep.subr.mxu1 %v10158_v1  ;;  %9133 = vmatprep.mubr.msk.f32.mxu0 %vm10157_vm0, %v10158_v1  ;;  %v4502_v53 = vsub.f32 %v4422_v49, %v4425_v51  ;;  %v6261_v15 = vand.u32 4294901760, %v6258_v13 }
 0x1ea   : > { %9136 = vmatprep.subr.mxu0 %v10158_v1  ;;  %v6328_v20 = vand.u32 4294901760, %v6327_v17 }
 0x1eb   : > { %v10489_v18 = vpop.permute.xlu0 %7172  ;;  %v4503_v55 = vand.u32 4294901760, %v4502_v53  ;;  %v6338_v19 = vsub.f32 %v6258_v13, %v6261_v15 }
 0x1ed   : > { %v6339_v16 = vand.u32 4294901760, %v6338_v19 }
 0x1ee   : > { %9079 = vmatmul.mubr.f32.vlgmr.msra.gmra.mrb[2].mxu1 %v819_v50 }
 0x1ef   : > { %9082 = vmatpush3.xpose.msra.mxu1 %v830_v63  ;;  %9134 = vmatmul.mubr.f32.vlgmr.msra.gmra.mrb[2].mxu0 %v1737_v5  ;;  %v10499_v23 = vpop.permute.xlu0 %1207  ;;  %v5408_v63 = vand.u32 4294901760, %v5338_v61 }
 0x1f0   : > { %9137 = vmatpush3.xpose.msra.mxu0 %v10447_v56  ;;  %9083 = vmatprep.mubr.msk.f32.mxu1 %vm10157_vm0, %v10158_v1  ;;  %v10503_v25 = vand.u32 4294901760, %v10499_v23 }
 0x1f1   : > { %9086 = vmatprep.subr.mxu1 %v10158_v1  ;;  %9138 = vmatprep.mubr.msk.f32.mxu0 %vm10157_vm0, %v10158_v1 }
 0x1f2   : > { %9141 = vmatprep.subr.mxu0 %v10158_v1 }
 0x1f6   : > { %9084 = vmatmul.mubr.f32.vlgmr.msra.gmra.mrb[2].mxu1 %v10442_v48 }
 0x1f7   : > { %9087 = vmatpush3.xpose.msra.mxu1 %v752_v57  ;;  %9139 = vmatmul.mubr.f32.vlgmr.msra.gmra.mrb[2].mxu0 %v1738_v8  ;;  %v4504_v57 = vsub.f32 %v4502_v53, %v4503_v55 }
 0x1f8   : > { %9142 = vmatpush3.xpose.msra.mxu0 %v1749_v3  ;;  %9088 = vmatprep.mubr.msk.f32.mxu1 %vm10157_vm0, %v10158_v1  ;;  %v5409_v3 = vsub.f32 %v5338_v61, %v5408_v63 }
 0x1f9   : > { %9091 = vmatprep.subr.mxu1 %v10158_v1  ;;  %9143 = vmatprep.mubr.msk.f32.mxu0 %vm10157_vm0, %v10158_v1  ;;  %v4505_v59 = vand.u32 4294901760, %v4504_v57 }
 0x1fa   : > { %9146 = vmatprep.subr.mxu0 %v10158_v1  ;;  %v5410_v5 = vand.u32 4294901760, %v5409_v3 }
 0x1fc   : > { %v5411_v7 = vsub.f32 %v5409_v3, %v5410_v5 }
 0x1fe   : > { %9089 = vmatmul.mubr.f32.vlgmr.msra.gmra.mrb[2].mxu1 %v10442_v48  ;;  %v4420_v48 = vsel %vm745_vm2, %v4417_v47, 0  ;;  %v5412_v9 = vand.u32 4294901760, %v5411_v7 }
 0x1ff   : > { %9092 = vmatpush3.msra.mxu1 %v10503_v25  ;;  %9144 = vmatmul.mubr.f32.vlgmr.msra.gmra.mrb[2].mxu0 %v10454_v2  ;;  %v4490_v50 = vand.u32 4294901760, %v4420_v48 }
 0x200   : > { %9147 = vmatpush3.xpose.msra.mxu0 %v10447_v56  ;;  %9148 = vmatprep.mubr.msk.f32.mxu0 %vm10157_vm0, %v10158_v1 }
 0x201   : > { %9181 = vmatprep.subr.mxu0 %v10158_v1  ;;  %9093 = vmatprep.mubr.msk.f32.mxu1 %vm10157_vm0, %v10158_v1  ;;  %v4491_v52 = vsub.f32 %v4420_v48, %v4490_v50 }
 0x202   : > { %9096 = vmatprep.subr.mxu1 %v10158_v1 }
 0x203   : > { %v4492_v54 = vand.u32 4294901760, %v4491_v52 }
 0x205   : > { %v4493_v56 = vsub.f32 %v4491_v52, %v4492_v54 }
 0x207   : > { %9149 = vmatmul.mubr.f32.vlgmr.msra.gmra.mrb[2].mxu0 %v10454_v2  ;;  %v4494_v58 = vand.u32 4294901760, %v4493_v56  ;;  %v5343_v2 = vand.u32 4294901760, %v5340_v62 }
 0x208   : > { %9182 = vmatpush3.xpose.msra.mxu0 %v2589_v22  ;;  %9183 = vmatprep.mubr.msk.f32.mxu0 %vm10157_vm0, %v10158_v1 }
 0x209   : > { %9186 = vmatprep.subr.mxu0 %v10158_v1  ;;  %v5420_v4 = vsub.f32 %v5340_v62, %v5343_v2 }
 0x20b   : > { %9184 = vmatmul.mubr.f32.vlgmr.msra.gmra.mrb[4].mxu0 %v2658_v31  ;;  %v5421_v6 = vand.u32 4294901760, %v5420_v4 }
 0x20c   : > { %9187 = vmatpush3.xpose.msra.mxu0 %v2669_v32  ;;  %9188 = vmatprep.mubr.msk.f32.mxu0 %vm10157_vm0, %v10158_v1  ;;  %v7176_v32 = vsel %vm745_vm2, %v10489_v18, 0 }
 0x20d   : > { %9191 = vmatprep.subr.mxu0 %v10158_v1  ;;  %v5422_v8 = vsub.f32 %v5420_v4, %v5421_v6  ;;  %v7179_v34 = vand.u32 4294901760, %v7176_v32 }
 0x20f   : > { %v5423_v10 = vand.u32 4294901760, %v5422_v8 }
 0x213   : > { %9189 = vmatmul.mubr.f32.vlgmr.msra.gmra.mrb[4].mxu0 %v2654_v21 }
 0x214   : > { %9192 = vmatpush3.xpose.msra.mxu0 %v2666_v26  ;;  %9193 = vmatprep.mubr.msk.f32.mxu0 %vm10157_vm0, %v10158_v1 }
 0x215   : > { %9196 = vmatprep.subr.mxu0 %v10158_v1 }
 0x21b   : > { %9194 = vmatmul.mubr.f32.vlgmr.msra.gmra.mrb[4].mxu0 %v2655_v24 }
 0x21c   : > { %9197 = vmatpush3.xpose.msra.mxu0 %v2589_v22  ;;  %9198 = vmatprep.mubr.msk.f32.mxu0 %vm10157_vm0, %v10158_v1 }
 0x21d   : > { %9201 = vmatprep.subr.mxu0 %v10158_v1 }
 0x223   : > { %9199 = vmatmul.mubr.f32.vlgmr.msra.gmra.mrb[4].mxu0 %v2656_v27  ;;  %v7171_v27 = vpop.permute.xlu1 %7170 }
 0x224   : > { %9202 = vmatpush3.xpose.msra.mxu0 %v2667_v28  ;;  %9203 = vmatprep.mubr.msk.f32.mxu0 %vm10157_vm0, %v10158_v1  ;;  %v7174_v29 = vsel %vm745_vm2, %v7171_v27, 0 }
 0x225   : > { %9206 = vmatprep.subr.mxu0 %v10158_v1  ;;  %v7244_v33 = vand.u32 4294901760, %v7174_v29 }
 0x227   : > { %v7245_v35 = vsub.f32 %v7174_v29, %v7244_v33 }
 0x229   : > { %v7246_v18 = vand.u32 4294901760, %v7245_v35 }
 0x22b   : > { %9204 = vmatmul.mubr.f32.vlgmr.msra.gmra.mrb[4].mxu0 %v2654_v21 }
 0x22c   : > { %9207 = vmatpush3.xpose.msra.mxu0 %v2589_v22  ;;  %9208 = vmatprep.mubr.msk.f32.mxu0 %vm10157_vm0, %v10158_v1  ;;  %v6340_v22 = vsub.f32 %v6338_v19, %v6339_v16 }
 0x22d   : > { %9241 = vmatprep.subr.mxu0 %v10158_v1 }
 0x22e   : > { %v6341_v26 = vand.u32 4294901760, %v6340_v22 }
 0x233   : > { %9209 = vmatmul.mubr.f32.vlgmr.msra.gmra.mrb[4].mxu0 %v2654_v21  ;;  %v6329_v21 = vsub.f32 %v6327_v17, %v6328_v20 }
 0x234   : > { %9242 = vmatpush3.xpose.msra.mxu0 %v3507_v37  ;;  %9243 = vmatprep.mubr.msk.f32.mxu0 %vm10157_vm0, %v10158_v1 }
 0x235   : > { %9246 = vmatprep.subr.mxu0 %v10158_v1  ;;  %v6330_v24 = vand.u32 4294901760, %v6329_v21 }
 0x237   : > { %9244 = vmatmul.mubr.f32.vlgmr.msra.gmra.mrb[6].mxu0 %v3576_v45 }
 0x238   : > { %9247 = vmatpush3.xpose.msra.mxu0 %v3587_v46  ;;  %9248 = vmatprep.mubr.msk.f32.mxu0 %vm10157_vm0, %v10158_v1 }
 0x239   : > { %9251 = vmatprep.subr.mxu0 %v10158_v1 }
 0x23f   : > { %9249 = vmatmul.mubr.f32.vlgmr.msra.gmra.mrb[6].mxu0 %v3572_v36 }
 0x240   : > { %9252 = vmatpush3.xpose.msra.mxu0 %v3584_v39  ;;  %9253 = vmatprep.mubr.msk.f32.mxu0 %vm10157_vm0, %v10158_v1 }
 0x241   : > { %9256 = vmatprep.subr.mxu0 %v10158_v1 }
 0x247   : > { %9254 = vmatmul.mubr.f32.vlgmr.msra.gmra.mrb[6].mxu0 %v3573_v38 }
 0x248   : > { %9257 = vmatpush3.xpose.msra.mxu0 %v3507_v37  ;;  %9258 = vmatprep.mubr.msk.f32.mxu0 %vm10157_vm0, %v10158_v1 }
 0x249   : > { %9261 = vmatprep.subr.mxu0 %v10158_v1 }
 0x24f   : > { %9259 = vmatmul.mubr.f32.vlgmr.msra.gmra.mrb[6].mxu0 %v3574_v40 }
 0x250   : > { %9262 = vmatpush3.xpose.msra.mxu0 %v3585_v41  ;;  %9263 = vmatprep.mubr.msk.f32.mxu0 %vm10157_vm0, %v10158_v1  ;;  %v7247_v41 = vsub.f32 %v7245_v35, %v7246_v18 }
 0x251   : > { %9266 = vmatprep.subr.mxu0 %v10158_v1 }
 0x252   : > { %v7248_v43 = vand.u32 4294901760, %v7247_v41 }
 0x257   : > { %9264 = vmatmul.mubr.f32.vlgmr.msra.gmra.mrb[6].mxu0 %v3572_v36 }
 0x258   : > { %9267 = vmatpush3.xpose.msra.mxu0 %v3507_v37  ;;  %9268 = vmatprep.mubr.msk.f32.mxu0 %vm10157_vm0, %v10158_v1 }
 0x259   : > { %9301 = vmatprep.subr.mxu0 %v10158_v1 }
 0x25f   : > { %9269 = vmatmul.mubr.f32.vlgmr.msra.gmra.mrb[6].mxu0 %v3572_v36  ;;  %v7256_v36 = vsub.f32 %v7176_v32, %v7179_v34 }
 0x260   : > { %9302 = vmatpush3.xpose.msra.mxu0 %v4425_v51  ;;  %9303 = vmatprep.mubr.msk.f32.mxu0 %vm10157_vm0, %v10158_v1 }
 0x261   : > { %9306 = vmatprep.subr.mxu0 %v10158_v1  ;;  %v7257_v40 = vand.u32 4294901760, %v7256_v36 }
 0x263   : > { %9304 = vmatmul.mubr.f32.vlgmr.msra.gmra.mrb[8].mxu0 %v4494_v58  ;;  %v7258_v42 = vsub.f32 %v7256_v36, %v7257_v40  ;;  %v1291_v58 = vsub.f32 %v10499_v23, %v10503_v25 }
 0x264   : > { %9307 = vmatpush3.xpose.msra.mxu0 %v4505_v59  ;;  %9308 = vmatprep.mubr.msk.f32.mxu0 %vm10157_vm0, %v10158_v1 }
 0x265   : > { %9311 = vmatprep.subr.mxu0 %v10158_v1  ;;  %v7259_v45 = vand.u32 4294901760, %v7258_v42  ;;  %v1292_v62 = vand.u32 4294901760, %v1291_v58 }
 0x26b   : > { %9309 = vmatmul.mubr.f32.vlgmr.msra.gmra.mrb[8].mxu0 %v4490_v50 }
 0x26c   : > { %9312 = vmatpush3.xpose.msra.mxu0 %v4502_v53  ;;  %9313 = vmatprep.mubr.msk.f32.mxu0 %vm10157_vm0, %v10158_v1 }
 0x26d   : > { %9316 = vmatprep.subr.mxu0 %v10158_v1 }
 0x273   : > { %9314 = vmatmul.mubr.f32.vlgmr.msra.gmra.mrb[8].mxu0 %v4491_v52 }
 0x274   : > { %9317 = vmatpush3.xpose.msra.mxu0 %v4425_v51  ;;  %9318 = vmatprep.mubr.msk.f32.mxu0 %vm10157_vm0, %v10158_v1 }
 0x275   : > { %9321 = vmatprep.subr.mxu0 %v10158_v1 }
 0x27b   : > { %9319 = vmatmul.mubr.f32.vlgmr.msra.gmra.mrb[8].mxu0 %v4492_v54 }
 0x27c   : > { %9322 = vmatpush3.xpose.msra.mxu0 %v4503_v55  ;;  %9323 = vmatprep.mubr.msk.f32.mxu0 %vm10157_vm0, %v10158_v1 }
 0x27d   : > { %9326 = vmatprep.subr.mxu0 %v10158_v1 }
 0x283   : > { %9324 = vmatmul.mubr.f32.vlgmr.msra.gmra.mrb[8].mxu0 %v4490_v50 }
 0x284   : > { %9327 = vmatpush3.xpose.msra.mxu0 %v4425_v51  ;;  %9328 = vmatprep.mubr.msk.f32.mxu0 %vm10157_vm0, %v10158_v1 }
 0x285   : > { %9361 = vmatprep.subr.mxu0 %v10158_v1 }
 0x28b   : > { %9329 = vmatmul.mubr.f32.vlgmr.msra.gmra.mrb[8].mxu0 %v4490_v50 }
 0x28c   : > { %9362 = vmatpush3.xpose.msra.mxu0 %v5343_v2  ;;  %9363 = vmatprep.mubr.msk.f32.mxu0 %vm10157_vm0, %v10158_v1 }
 0x28d   : > { %9366 = vmatprep.subr.mxu0 %v10158_v1 }
 0x28f   : > { %9364 = vmatmul.mubr.f32.vlgmr.msra.gmra.mrb[10].mxu0 %v5412_v9 }
 0x290   : > { %9367 = vmatpush3.xpose.msra.mxu0 %v5423_v10  ;;  %9368 = vmatprep.mubr.msk.f32.mxu0 %vm10157_vm0, %v10158_v1 }
 0x291   : > { %9371 = vmatprep.subr.mxu0 %v10158_v1 }
 0x297   : > { %9369 = vmatmul.mubr.f32.vlgmr.msra.gmra.mrb[10].mxu0 %v5408_v63 }
 0x298   : > { %9372 = vmatpush3.xpose.msra.mxu0 %v5420_v4  ;;  %9373 = vmatprep.mubr.msk.f32.mxu0 %vm10157_vm0, %v10158_v1 }
 0x299   : > { %9376 = vmatprep.subr.mxu0 %v10158_v1 }
 0x29f   : > { %9374 = vmatmul.mubr.f32.vlgmr.msra.gmra.mrb[10].mxu0 %v5409_v3  ;;  %v1293_v3 = vsub.f32 %v1291_v58, %v1292_v62 }
 0x2a0   : > { %9377 = vmatpush3.xpose.msra.mxu0 %v5343_v2  ;;  %9378 = vmatprep.mubr.msk.f32.mxu0 %vm10157_vm0, %v10158_v1 }
 0x2a1   : > { %9381 = vmatprep.subr.mxu0 %v10158_v1 }
 0x2a7   : > { %9379 = vmatmul.mubr.f32.vlgmr.msra.gmra.mrb[10].mxu0 %v5410_v5 }
 0x2a8   : > { %9382 = vmatpush3.xpose.msra.mxu0 %v5421_v6  ;;  %9383 = vmatprep.mubr.msk.f32.mxu0 %vm10157_vm0, %v10158_v1  ;;  %v1294_v6 = vand.u32 4294901760, %v1293_v3 }
 0x2a9   : > { %9386 = vmatprep.subr.mxu0 %v10158_v1 }
 0x2af   : > { %9384 = vmatmul.mubr.f32.vlgmr.msra.gmra.mrb[10].mxu0 %v5408_v63 }
 0x2b0   : > { %9387 = vmatpush3.xpose.msra.mxu0 %v5343_v2  ;;  %9388 = vmatprep.mubr.msk.f32.mxu0 %vm10157_vm0, %v10158_v1 }
 0x2b1   : > { %9421 = vmatprep.subr.mxu0 %v10158_v1 }
 0x2b7   : > { %9389 = vmatmul.mubr.f32.vlgmr.msra.gmra.mrb[10].mxu0 %v5408_v63 }
 0x2b8   : > { %9422 = vmatpush3.xpose.msra.mxu0 %v6261_v15  ;;  %9423 = vmatprep.mubr.msk.f32.mxu0 %vm10157_vm0, %v10158_v1 }
 0x2b9   : > { %9426 = vmatprep.subr.mxu0 %v10158_v1 }
 0x2bb   : > { %9424 = vmatmul.mubr.f32.vlgmr.msra.gmra.mrb[12].mxu0 %v6330_v24 }
 0x2bc   : > { %9427 = vmatpush3.xpose.msra.mxu0 %v6341_v26  ;;  %9428 = vmatprep.mubr.msk.f32.mxu0 %vm10157_vm0, %v10158_v1 }
 0x2bd   : > { %9431 = vmatprep.subr.mxu0 %v10158_v1 }
 0x2c3   : > { %9429 = vmatmul.mubr.f32.vlgmr.msra.gmra.mrb[12].mxu0 %v6326_v14 }
 0x2c4   : > { %9432 = vmatpush3.xpose.msra.mxu0 %v6338_v19  ;;  %9433 = vmatprep.mubr.msk.f32.mxu0 %vm10157_vm0, %v10158_v1 }
 0x2c5   : > { %9436 = vmatprep.subr.mxu0 %v10158_v1 }
 0x2cb   : > { %9434 = vmatmul.mubr.f32.vlgmr.msra.gmra.mrb[12].mxu0 %v6327_v17 }
 0x2cc   : > { %9437 = vmatpush3.xpose.msra.mxu0 %v6261_v15  ;;  %9438 = vmatprep.mubr.msk.f32.mxu0 %vm10157_vm0, %v10158_v1 }
 0x2cd   : > { %9441 = vmatprep.subr.mxu0 %v10158_v1 }
 0x2d1   : > { %v10612_v28 = vpop.f32.mrb[2].mxu1 }
 0x2d2   : > { %v9090_v30 = vpop.f32.mrb[3].mxu1  ;;  %v1198_v31 = vsel %vm1197_vm3, %v10612_v28, -inf }
 0x2d3   : > { %9439 = vmatmul.mubr.f32.vlgmr.msra.gmra.mrb[12].mxu0 %v6328_v20  ;;  %1199 = vmax.xlane.f32.xlu1 %v1198_v31 }
 0x2d4   : > { %9442 = vmatpush3.xpose.msra.mxu0 %v6339_v16  ;;  %9443 = vmatprep.mubr.msk.f32.mxu0 %vm10157_vm0, %v10158_v1 }
 0x2d5   : > { %9446 = vmatprep.subr.mxu0 %v10158_v1 }
 0x2da   : > { %v10622_v37 = vpop.f32.mrb[2].mxu0 }
 0x2db   : > { %v9150_v38 = vpop.f32.mrb[3].mxu0  ;;  %9444 = vmatmul.mubr.f32.vlgmr.msra.gmra.mrb[12].mxu0 %v6326_v14  ;;  %v2116_v39 = vsel %vm1197_vm3, %v10622_v37, -inf }
 0x2dc   : > { %9447 = vmatpush3.xpose.msra.mxu0 %v6261_v15  ;;  %2117 = vmax.xlane.f32.xlu0 %v2116_v39 }
 0x2dd   : > { %9448 = vmatprep.mubr.msk.f32.mxu0 %vm10157_vm0, %v10158_v1  ;;  %9481 = vmatprep.subr.mxu0 %v10158_v1 }
 0x2e3   : > { %9449 = vmatmul.mubr.f32.vlgmr.msra.gmra.mrb[12].mxu0 %v6326_v14 }
 0x2e4   : > { %9482 = vmatpush3.xpose.msra.mxu0 %v7179_v34  ;;  %2125 = vrot.lane.b32.xlu1 %v10429_v44, %s10175_s23 }
 0x2e5   : > { %9483 = vmatprep.mubr.msk.f32.mxu0 %vm10157_vm0, %v10158_v1  ;;  %9486 = vmatprep.subr.mxu0 %v10158_v1 }
 0x2e7   : > { %9484 = vmatmul.mubr.f32.vlgmr.msra.gmra.mrb[14].mxu0 %v7248_v43 }
 0x2e8   : > { %9487 = vmatpush3.xpose.msra.mxu0 %v7259_v45  ;;  %9488 = vmatprep.mubr.msk.f32.mxu0 %vm10157_vm0, %v10158_v1 }
 0x2e9   : > { %9491 = vmatprep.subr.mxu0 %v10158_v1 }
 0x2ef   : > { %9489 = vmatmul.mubr.f32.vlgmr.msra.gmra.mrb[14].mxu0 %v7244_v33 }
 0x2f0   : > { %9492 = vmatpush3.xpose.msra.mxu0 %v7256_v36  ;;  %9493 = vmatprep.mubr.msk.f32.mxu0 %vm10157_vm0, %v10158_v1 }
 0x2f1   : > { %9496 = vmatprep.subr.mxu0 %v10158_v1 }
 0x2f7   : > { %9494 = vmatmul.mubr.f32.vlgmr.msra.gmra.mrb[14].mxu0 %v7245_v35 }
 0x2f8   : > { %9497 = vmatpush3.xpose.msra.mxu0 %v7179_v34  ;;  %9498 = vmatprep.mubr.msk.f32.mxu0 %vm10157_vm0, %v10158_v1 }
 0x2f9   : > { %9501 = vmatprep.subr.mxu0 %v10158_v1 }
 0x2ff   : > { %9499 = vmatmul.mubr.f32.vlgmr.msra.gmra.mrb[14].mxu0 %v7246_v18 }
 0x300   : > { %9502 = vmatpush3.xpose.msra.mxu0 %v7257_v40  ;;  %9503 = vmatprep.mubr.msk.f32.mxu0 %vm10157_vm0, %v10158_v1 }
 0x301   : > { %9506 = vmatprep.subr.mxu0 %v10158_v1 }
 0x306   : > { %v10645_v46 = vpop.f32.mrb[4].mxu0 }
 0x307   : > { %v9210_v47 = vpop.f32.mrb[5].mxu0  ;;  %9504 = vmatmul.mubr.f32.vlgmr.msra.gmra.mrb[14].mxu0 %v7244_v33  ;;  %v3034_v48 = vsel %vm1197_vm3, %v10645_v46, -inf }
 0x308   : > { %9507 = vmatpush3.xpose.msra.mxu0 %v7179_v34  ;;  %3035 = vmax.xlane.f32.xlu0 %v3034_v48 }
 0x309   : > { %9508 = vmatprep.mubr.msk.f32.mxu0 %vm10157_vm0, %v10158_v1  ;;  %9643 = vmatprep.subr.bf16.mxu0 %v10156_v0 }
 0x30f   : > { %9509 = vmatmul.mubr.f32.vlgmr.msra.gmra.mrb[14].mxu0 %v7244_v33 }
 0x310   : > { %9549 = vmatprep.mubr.msk.f32.mxu0 %vm10157_vm0, %v10158_v1 }
 0x31e   : > { %3043 = vrot.lane.b32.xlu0 %v10429_v44, %s10176_s27  ;;  %s8740_s27 = sshll.u32 %s10236_s19, 7 }
 0x322   : > { %3961 = vrot.lane.b32.xlu0 %v10429_v44, %s10177_s30  ;;  %s241_s30 = scalar_lea.vmem [#allocation8], %s8734_s25  ;;  %s10189_s25 = smov [#allocation8]  }
 0x332   : > { %v10656_v49 = vpop.f32.mrb[6].mxu0 }
 0x333   : > { %v9270_v50 = vpop.f32.mrb[7].mxu0  ;;  %v3952_v51 = vsel %vm1197_vm3, %v10656_v49, -inf }
 0x334   : > { %3953 = vmax.xlane.f32.xlu1 %v3952_v51 }
 0x345   : > { %4879 = vrot.lane.b32.xlu1 %v10429_v44, %s10178_s5  ;;  %s8637_s5 = sshll.u32 %s241_s30, 4  ;;  %s10942_s5 = int_to_ptr.vmem [resolvable:$true] %s8637_s5 }
 0x346   : > { %s10079_s19 = scalar_lea.vmem %s10942_s5, 128 }
 0x347   : > { %p10080_p11 = scmp.ne.s32.totalorder %s10942_s5, %s10079_s19 }
 0x349   : > { %p10081_p1 = pnand %p10080_p11, %p11003_p0 }
 0x34b   : > { %p10082_p3 = pneg %p10081_p1 }
 0x35e   : > { %v10661_v52 = vpop.f32.mrb[8].mxu0 }
 0x35f   : > { %v9330_v53 = vpop.f32.mrb[9].mxu0  ;;  %v4870_v54 = vsel %vm1197_vm3, %v10661_v52, -inf }
 0x360   : > { %4871 = vmax.xlane.f32.xlu0 %v4870_v54  ;;  %v1200_v55 = vpop.xlane.xlu1 %1199 }
 0x361   : > { %v1201_v56 = vsub.f32 %v10612_v28, %v1200_v55 }
 0x363   : > { %v1202_v57 = vmul.f32 1.442695, %v1201_v56 }
 0x364   : > { %v2126_v14 = vpop.permute.xlu1 %2125 }
 0x365   : > { %9961 = vpow2.f32 %v1202_v57  ;;  %v2132_v17 = vand.u32 4294901760, %v2126_v14 }
 0x367   : > { %v2209_v20 = vsub.f32 %v2126_v14, %v2132_v17 }
 0x369   : > { %v2118_v7 = vpop.xlane.xlu0 %2117  ;;  %v2210_v21 = vand.u32 4294901760, %v2209_v20 }
 0x36a   : > { %v2119_v23 = vsub.f32 %v10622_v37, %v2118_v7 }
 0x36b   : > { %v2211_v24 = vsub.f32 %v2209_v20, %v2210_v21 }
 0x36c   : > { %v2120_v8 = vmul.f32 1.442695, %v2119_v23 }
 0x36d   : > { %v2212_v26 = vand.u32 4294901760, %v2211_v24 }
 0x36e   : > { %9963 = vpow2.f32 %v2120_v8 }
 0x36f   : > { %v10668_v59 = vpop.eup %9961 }
 0x370   : > { %v1211_v60 = vsel %vm1197_vm3, %v10668_v59, 0 }
 0x371   : > { %v1279_v61 = vand.u32 4294901760, %v1211_v60 }
 0x373   : > { %v1280_v63 = vsub.f32 %v1211_v60, %v1279_v61 }
 0x375   : > { %v1281_v2 = vand.u32 4294901760, %v1280_v63 }
 0x377   : > { %v1282_v4 = vsub.f32 %v1280_v63, %v1281_v2 }
 0x378   : > { %v10687_v12 = vpop.eup %9963 }
 0x379   : > { %v1283_v5 = vand.u32 4294901760, %v1282_v4  ;;  %v2129_v13 = vsel %vm1197_vm3, %v10687_v12, 0  ;;  %v2122_v57 = vsel %vm1197_vm3, %v10687_v12, 0.0 }
 0x37a   : > { %v10693_v15 = vand.u32 4294901760, %v2129_v13 }
 0x37b   : > { %9094 = vmatmul.mubr.f32.vlgmr.msra.gmra.mrb[4].mxu1 %v1283_v5 }
 0x37c   : > { %9097 = vmatpush3.msra.mxu1 %v1294_v6  ;;  %9098 = vmatprep.mubr.msk.f32.mxu1 %vm10157_vm0, %v10158_v1  ;;  %v2198_v19 = vsub.f32 %v2129_v13, %v10693_v15 }
 0x37d   : > { %9101 = vmatprep.subr.mxu1 %v10158_v1 }
 0x37e   : > { %v2199_v16 = vand.u32 4294901760, %v2198_v19 }
 0x380   : > { %v2200_v22 = vsub.f32 %v2198_v19, %v2199_v16 }
 0x383   : > { %9099 = vmatmul.mubr.f32.vlgmr.msra.gmra.mrb[4].mxu1 %v1279_v61 }
 0x384   : > { %9102 = vmatpush3.msra.mxu1 %v1291_v58  ;;  %9103 = vmatprep.mubr.msk.f32.mxu1 %vm10157_vm0, %v10158_v1 }
 0x385   : > { %9106 = vmatprep.subr.mxu1 %v10158_v1 }
 0x38a   : > { %v10679_v9 = vpop.f32.mrb[10].mxu0 }
 0x38b   : > { %9104 = vmatmul.mubr.f32.vlgmr.msra.gmra.mrb[4].mxu1 %v1280_v63  ;;  %v9390_v10 = vpop.f32.mrb[11].mxu0  ;;  %v5788_v11 = vsel %vm1197_vm3, %v10679_v9, -inf }
 0x38c   : > { %9107 = vmatpush3.msra.mxu1 %v10503_v25  ;;  %5789 = vmax.xlane.f32.xlu0 %v5788_v11 }
 0x38d   : > { %9108 = vmatprep.mubr.msk.f32.mxu1 %vm10157_vm0, %v10158_v1  ;;  %9111 = vmatprep.subr.mxu1 %v10158_v1 }
 0x393   : > { %9109 = vmatmul.mubr.f32.vlgmr.msra.gmra.mrb[4].mxu1 %v1281_v2 }
 0x394   : > { %9112 = vmatpush3.msra.mxu1 %v1292_v62  ;;  %9113 = vmatprep.mubr.msk.f32.mxu1 %vm10157_vm0, %v10158_v1 }
 0x395   : > { %9116 = vmatprep.subr.mxu1 %v10158_v1  ;;  %v3036_v27 = vpop.xlane.xlu0 %3035 }
 0x396   : > { %v3037_v28 = vsub.f32 %v10645_v46, %v3036_v27 }
 0x398   : > { %v3038_v29 = vmul.f32 1.442695, %v3037_v28 }
 0x399   : > { %v3044_v35 = vpop.permute.xlu0 %3043 }
 0x39a   : > { %9965 = vpow2.f32 %v3038_v29  ;;  %v3050_v37 = vand.u32 4294901760, %v3044_v35 }
 0x39b   : > { %9114 = vmatmul.mubr.f32.vlgmr.msra.gmra.mrb[4].mxu1 %v1279_v61 }
 0x39c   : > { %9117 = vmatpush3.msra.mxu1 %v10503_v25  ;;  %9118 = vmatprep.mubr.msk.f32.mxu1 %vm10157_vm0, %v10158_v1  ;;  %v2201_v25 = vand.u32 4294901760, %v2200_v22  ;;  %v3127_v39 = vsub.f32 %v3044_v35, %v3050_v37 }
 0x39d   : > { %9151 = vmatprep.subr.mxu1 %v10158_v1  ;;  %v3962_v54 = vpop.permute.xlu0 %3961 }
 0x39e   : > { %v3128_v40 = vand.u32 4294901760, %v3127_v39 }
 0x3a0   : > { %v3129_v42 = vsub.f32 %v3127_v39, %v3128_v40 }
 0x3a2   : > { %5797 = vrot.lane.b32.xlu0 %v10429_v44, %s10179_s6  ;;  %v3130_v45 = vand.u32 4294901760, %v3129_v42 }
 0x3a3   : > { %9119 = vmatmul.mubr.f32.vlgmr.msra.gmra.mrb[4].mxu1 %v1279_v61  ;;  %v3968_v61 = vand.u32 4294901760, %v3962_v54 }
 0x3a4   : > { %9152 = vmatpush3.msra.mxu1 %v2132_v17  ;;  %9153 = vmatprep.mubr.msk.f32.mxu1 %vm10157_vm0, %v10158_v1  ;;  %v9966_v33 = vpop.eup %9965 }
 0x3a5   : > { %9156 = vmatprep.subr.mxu1 %v10158_v1  ;;  %v3047_v34 = vsel %vm1197_vm3, %v9966_v33, 0  ;;  %v3040_v53 = vsel %vm1197_vm3, %v9966_v33, 0.0  ;;  %v4045_v3 = vsub.f32 %v3962_v54, %v3968_v61 }
 0x3a6   : > { %6715 = vrot.lane.b32.xlu0 %v10429_v44, %s10180_s26  ;;  %v10724_v36 = vand.u32 4294901760, %v3047_v34 }
 0x3a7   : > { %9154 = vmatmul.mubr.f32.vlgmr.msra.gmra.mrb[6].mxu1 %v2201_v25  ;;  %v4046_v5 = vand.u32 4294901760, %v4045_v3 }
 0x3a8   : > { %9157 = vmatpush3.msra.mxu1 %v2212_v26  ;;  %9158 = vmatprep.mubr.msk.f32.mxu1 %vm10157_vm0, %v10158_v1  ;;  %v3116_v38 = vsub.f32 %v3047_v34, %v10724_v36 }
 0x3a9   : > { %9161 = vmatprep.subr.mxu1 %v10158_v1  ;;  %v4047_v7 = vsub.f32 %v4045_v3, %v4046_v5 }
 0x3aa   : > { %v3117_v18 = vand.u32 4294901760, %v3116_v38 }
 0x3ab   : > { %v4048_v10 = vand.u32 4294901760, %v4047_v7 }
 0x3ac   : > { %v3118_v41 = vsub.f32 %v3116_v38, %v3117_v18 }
 0x3ae   : > { %v3119_v43 = vand.u32 4294901760, %v3118_v41 }
 0x3af   : > { %9159 = vmatmul.mubr.f32.vlgmr.msra.gmra.mrb[6].mxu1 %v10693_v15 }
 0x3b0   : > { %9162 = vmatpush3.msra.mxu1 %v2209_v20  ;;  %9163 = vmatprep.mubr.msk.f32.mxu1 %vm10157_vm0, %v10158_v1 }
 0x3b1   : > { %9166 = vmatprep.subr.mxu1 %v10158_v1 }
 0x3b6   : > { %v10714_v30 = vpop.f32.mrb[12].mxu0 }
 0x3b7   : > { %9164 = vmatmul.mubr.f32.vlgmr.msra.gmra.mrb[6].mxu1 %v2198_v19  ;;  %v9450_v31 = vpop.f32.mrb[13].mxu0  ;;  %v6706_v32 = vsel %vm1197_vm3, %v10714_v30, -inf }
 0x3b8   : > { %9167 = vmatpush3.msra.mxu1 %v2132_v17  ;;  %6707 = vmax.xlane.f32.xlu1 %v6706_v32 }
 0x3b9   : > { %9168 = vmatprep.mubr.msk.f32.mxu1 %vm10157_vm0, %v10158_v1  ;;  %9171 = vmatprep.subr.mxu1 %v10158_v1 }
 0x3bf   : > { %9169 = vmatmul.mubr.f32.vlgmr.msra.gmra.mrb[6].mxu1 %v2199_v16 }
 0x3c0   : > { %9172 = vmatpush3.msra.mxu1 %v2210_v21  ;;  %9173 = vmatprep.mubr.msk.f32.mxu1 %vm10157_vm0, %v10158_v1 }
 0x3c1   : > { %9176 = vmatprep.subr.mxu1 %v10158_v1  ;;  %v3954_v46 = vpop.xlane.xlu1 %3953 }
 0x3c5   : > { %v4880_v12 = vpop.permute.xlu1 %4879 }
 0x3c7   : > { %9174 = vmatmul.mubr.f32.vlgmr.msra.gmra.mrb[6].mxu1 %v10693_v15 }
 0x3c8   : > { %9177 = vmatpush3.msra.mxu1 %v2132_v17  ;;  %9178 = vmatprep.mubr.msk.f32.mxu1 %vm10157_vm0, %v10158_v1 }
 0x3c9   : > { %7633 = vrot.lane.b32.xlu1 %v10429_v44, %s10181_s10  ;;  %9211 = vmatprep.subr.mxu1 %v10158_v1  ;;  %v3955_v44 = vsub.f32 %v10656_v49, %v3954_v46  ;;  %s10940_s10 = scalar_lea.hbm %s10989_s4, %s8740_s27 }
 0x3cb   : > { %v3956_v47 = vmul.f32 1.442695, %v3955_v44 }
 0x3cd   : > { %9967 = vpow2.f32 %v3956_v47 }
 0x3cf   : > { %9179 = vmatmul.mubr.f32.vlgmr.msra.gmra.mrb[6].mxu1 %v10693_v15  ;;  %v4886_v15 = vand.u32 4294901760, %v4880_v12 }
 0x3d0   : > { %9212 = vmatpush3.msra.mxu1 %v3050_v37  ;;  %9213 = vmatprep.mubr.msk.f32.mxu1 %vm10157_vm0, %v10158_v1 }
 0x3d1   : > { %9216 = vmatprep.subr.mxu1 %v10158_v1  ;;  %v4963_v16 = vsub.f32 %v4880_v12, %v4886_v15 }
 0x3d3   : > { %9214 = vmatmul.mubr.f32.vlgmr.msra.gmra.mrb[8].mxu1 %v3119_v43  ;;  %v4964_v22 = vand.u32 4294901760, %v4963_v16 }
 0x3d4   : > { %9217 = vmatpush3.msra.mxu1 %v3130_v45  ;;  %9218 = vmatprep.mubr.msk.f32.mxu1 %vm10157_vm0, %v10158_v1 }
 0x3d5   : > { %9221 = vmatprep.subr.mxu1 %v10158_v1  ;;  %v4965_v25 = vsub.f32 %v4963_v16, %v4964_v22 }
 0x3d7   : > { %v9968_v49 = vpop.eup %9967  ;;  %v4966_v28 = vand.u32 4294901760, %v4965_v25 }
 0x3d8   : > { %v3965_v55 = vsel %vm1197_vm3, %v9968_v49, 0  ;;  %v3958_v56 = vsel %vm1197_vm3, %v9968_v49, 0.0 }
 0x3d9   : > { %v4033_v58 = vand.u32 4294901760, %v3965_v55 }
 0x3db   : > { %9219 = vmatmul.mubr.f32.vlgmr.msra.gmra.mrb[8].mxu1 %v10724_v36  ;;  %v4034_v2 = vsub.f32 %v3965_v55, %v4033_v58 }
 0x3dc   : > { %9222 = vmatpush3.msra.mxu1 %v3127_v39  ;;  %9223 = vmatprep.mubr.msk.f32.mxu1 %vm10157_vm0, %v10158_v1 }
 0x3dd   : > { %9226 = vmatprep.subr.mxu1 %v10158_v1  ;;  %v4035_v4 = vand.u32 4294901760, %v4034_v2 }
 0x3df   : > { %v4036_v6 = vsub.f32 %v4034_v2, %v4035_v4 }
 0x3e1   : > { %v4037_v8 = vand.u32 4294901760, %v4036_v6 }
 0x3e2   : > { %v10745_v48 = vpop.f32.mrb[14].mxu0 }
 0x3e3   : > { %9224 = vmatmul.mubr.f32.vlgmr.msra.gmra.mrb[8].mxu1 %v3116_v38  ;;  %v9510_v50 = vpop.f32.mrb[15].mxu0  ;;  %v7624_v51 = vsel %vm1197_vm3, %v10745_v48, -inf }
 0x3e4   : > { %9227 = vmatpush3.msra.mxu1 %v3050_v37  ;;  %7625 = vmax.xlane.f32.xlu0 %v7624_v51 }
 0x3e5   : > { %9228 = vmatprep.mubr.msk.f32.mxu1 %vm10157_vm0, %v10158_v1  ;;  %9231 = vmatprep.subr.mxu1 %v10158_v1 }
 0x3e8   : > { %3041 = vadd.xlane.f32.xlu0 %v3040_v53 }
 0x3eb   : > { %9229 = vmatmul.mubr.f32.vlgmr.msra.gmra.mrb[8].mxu1 %v3117_v18 }
 0x3ec   : > { %9232 = vmatpush3.msra.mxu1 %v3128_v40  ;;  %3959 = vadd.xlane.f32.xlu0 %v3958_v56 }
 0x3ed   : > { %v4872_v60 = vpop.xlane.xlu0 %4871  ;;  %2123 = vadd.xlane.f32.xlu1 %v2122_v57  ;;  %9233 = vmatprep.mubr.msk.f32.mxu1 %vm10157_vm0, %v10158_v1 }
 0x3ee   : > { %v4873_v62 = vsub.f32 %v10661_v52, %v4872_v60  ;;  %9236 = vmatprep.subr.mxu1 %v10158_v1 }
 0x3f0   : > { %v4874_v63 = vmul.f32 1.442695, %v4873_v62 }
 0x3f2   : > { %9969 = vpow2.f32 %v4874_v63 }
 0x3f3   : > { %9234 = vmatmul.mubr.f32.vlgmr.msra.gmra.mrb[8].mxu1 %v10724_v36 }
 0x3f4   : > { %9237 = vmatpush3.msra.mxu1 %v3050_v37  ;;  %9238 = vmatprep.mubr.msk.f32.mxu1 %vm10157_vm0, %v10158_v1 }
 0x3f5   : > { %9271 = vmatprep.subr.mxu1 %v10158_v1 }
 0x3fb   : > { %9239 = vmatmul.mubr.f32.vlgmr.msra.gmra.mrb[8].mxu1 %v10724_v36 }
 0x3fc   : > { %v9970_v52 = vpop.eup %9969  ;;  %9272 = vmatpush3.msra.mxu1 %v3968_v61  ;;  %9273 = vmatprep.mubr.msk.f32.mxu1 %vm10157_vm0, %v10158_v1 }
 0x3fd   : > { %9276 = vmatprep.subr.mxu1 %v10158_v1  ;;  %v4876_v23 = vsel %vm1197_vm3, %v9970_v52, 0.0  ;;  %v4883_v11 = vsel %vm1197_vm3, %v9970_v52, 0 }
 0x3fe   : > { %4877 = vadd.xlane.f32.xlu0 %v4876_v23  ;;  %v4951_v13 = vand.u32 4294901760, %v4883_v11 }
 0x3ff   : > { %9274 = vmatmul.mubr.f32.vlgmr.msra.gmra.mrb[10].mxu1 %v4037_v8 }
 0x400   : > { %9277 = vmatpush3.msra.mxu1 %v4048_v10  ;;  %9278 = vmatprep.mubr.msk.f32.mxu1 %vm10157_vm0, %v10158_v1  ;;  %v4952_v20 = vsub.f32 %v4883_v11, %v4951_v13 }
 0x401   : > { %9281 = vmatprep.subr.mxu1 %v10158_v1 }
 0x402   : > { %v4953_v21 = vand.u32 4294901760, %v4952_v20 }
 0x404   : > { %v4954_v24 = vsub.f32 %v4952_v20, %v4953_v21 }
 0x406   : > { %v4955_v27 = vand.u32 4294901760, %v4954_v24 }
 0x407   : > { %9279 = vmatmul.mubr.f32.vlgmr.msra.gmra.mrb[10].mxu1 %v4033_v58 }
 0x408   : > { %9282 = vmatpush3.msra.mxu1 %v4045_v3  ;;  %9283 = vmatprep.mubr.msk.f32.mxu1 %vm10157_vm0, %v10158_v1 }
 0x409   : > { %9286 = vmatprep.subr.mxu1 %v10158_v1 }
 0x40f   : > { %9284 = vmatmul.mubr.f32.vlgmr.msra.gmra.mrb[10].mxu1 %v4034_v2 }
 0x410   : > { %9287 = vmatpush3.msra.mxu1 %v3968_v61  ;;  %9288 = vmatprep.mubr.msk.f32.mxu1 %vm10157_vm0, %v10158_v1 }
 0x411   : > { %9291 = vmatprep.subr.mxu1 %v10158_v1 }
 0x417   : > { %9289 = vmatmul.mubr.f32.vlgmr.msra.gmra.mrb[10].mxu1 %v4035_v4  ;;  %v1204_v4 = vsel %vm1197_vm3, %v10668_v59, 0.0 }
 0x418   : > { %9292 = vmatpush3.msra.mxu1 %v4046_v5  ;;  %9293 = vmatprep.mubr.msk.f32.mxu1 %vm10157_vm0, %v10158_v1 }
 0x419   : > { %v5790_v14 = vpop.xlane.xlu0 %5789  ;;  %9296 = vmatprep.subr.mxu1 %v10158_v1 }
 0x41a   : > { %v5791_v17 = vsub.f32 %v10679_v9, %v5790_v14 }
 0x41c   : > { %v5792_v19 = vmul.f32 1.442695, %v5791_v17 }
 0x41d   : > { %v5798_v31 = vpop.permute.xlu0 %5797 }
 0x41e   : > { %9971 = vpow2.f32 %v5792_v19  ;;  %v5804_v34 = vand.u32 4294901760, %v5798_v31 }
 0x41f   : > { %9294 = vmatmul.mubr.f32.vlgmr.msra.gmra.mrb[10].mxu1 %v4033_v58 }
 0x420   : > { %9297 = vmatpush3.msra.mxu1 %v3968_v61  ;;  %9298 = vmatprep.mubr.msk.f32.mxu1 %vm10157_vm0, %v10158_v1  ;;  %v5881_v38 = vsub.f32 %v5798_v31, %v5804_v34 }
 0x421   : > { %9331 = vmatprep.subr.mxu1 %v10158_v1  ;;  %v6716_v46 = vpop.permute.xlu0 %6715 }
 0x422   : > { %v5882_v18 = vand.u32 4294901760, %v5881_v38  ;;  %v6722_v51 = vand.u32 4294901760, %v6716_v46 }
 0x424   : > { %v5883_v41 = vsub.f32 %v5881_v38, %v5882_v18  ;;  %v6799_v55 = vsub.f32 %v6716_v46, %v6722_v51 }
 0x426   : > { %v5884_v45 = vand.u32 4294901760, %v5883_v41  ;;  %v6800_v60 = vand.u32 4294901760, %v6799_v55 }
 0x427   : > { %9299 = vmatmul.mubr.f32.vlgmr.msra.gmra.mrb[10].mxu1 %v4033_v58 }
 0x428   : > { %v9972_v26 = vpop.eup %9971  ;;  %9332 = vmatpush3.msra.mxu1 %v4886_v15  ;;  %9333 = vmatprep.mubr.msk.f32.mxu1 %vm10157_vm0, %v10158_v1  ;;  %v6801_v62 = vsub.f32 %v6799_v55, %v6800_v60 }
 0x429   : > { %v5794_v9 = vsel %vm1197_vm3, %v9972_v26, 0.0  ;;  %9336 = vmatprep.subr.mxu1 %v10158_v1  ;;  %v5801_v29 = vsel %vm1197_vm3, %v9972_v26, 0 }
 0x42a   : > { %5795 = vadd.xlane.f32.xlu0 %v5794_v9  ;;  %v5869_v32 = vand.u32 4294901760, %v5801_v29  ;;  %v6802_v3 = vand.u32 4294901760, %v6801_v62 }
 0x42b   : > { %9334 = vmatmul.mubr.f32.vlgmr.msra.gmra.mrb[12].mxu1 %v4955_v27 }
 0x42c   : > { %9337 = vmatpush3.msra.mxu1 %v4966_v28  ;;  %9338 = vmatprep.mubr.msk.f32.mxu1 %vm10157_vm0, %v10158_v1  ;;  %v5870_v37 = vsub.f32 %v5801_v29, %v5869_v32 }
 0x42d   : > { %9341 = vmatprep.subr.mxu1 %v10158_v1 }
 0x42e   : > { %v5871_v39 = vand.u32 4294901760, %v5870_v37 }
 0x430   : > { %v5872_v40 = vsub.f32 %v5870_v37, %v5871_v39 }
 0x432   : > { %v5873_v43 = vand.u32 4294901760, %v5872_v40 }
 0x433   : > { %9339 = vmatmul.mubr.f32.vlgmr.msra.gmra.mrb[12].mxu1 %v4951_v13 }
 0x434   : > { %9342 = vmatpush3.msra.mxu1 %v4963_v16  ;;  %9343 = vmatprep.mubr.msk.f32.mxu1 %vm10157_vm0, %v10158_v1 }
 0x435   : > { %9346 = vmatprep.subr.mxu1 %v10158_v1 }
 0x43b   : > { %9344 = vmatmul.mubr.f32.vlgmr.msra.gmra.mrb[12].mxu1 %v4952_v20 }
 0x43c   : > { %9347 = vmatpush3.msra.mxu1 %v4886_v15  ;;  %9348 = vmatprep.mubr.msk.f32.mxu1 %vm10157_vm0, %v10158_v1 }
 0x43d   : > { %9351 = vmatprep.subr.mxu1 %v10158_v1 }
 0x443   : > { %9349 = vmatmul.mubr.f32.vlgmr.msra.gmra.mrb[12].mxu1 %v4953_v21 }
 0x444   : > { %9352 = vmatpush3.msra.mxu1 %v4964_v22  ;;  %9353 = vmatprep.mubr.msk.f32.mxu1 %vm10157_vm0, %v10158_v1 }
 0x445   : > { %v6708_v33 = vpop.xlane.xlu1 %6707  ;;  %9356 = vmatprep.subr.mxu1 %v10158_v1 }
 0x446   : > { %v6709_v35 = vsub.f32 %v10714_v30, %v6708_v33 }
 0x448   : > { %v6710_v36 = vmul.f32 1.442695, %v6709_v35 }
 0x449   : > { %v7634_v5 = vpop.permute.xlu1 %7633 }
 0x44a   : > { %9973 = vpow2.f32 %v6710_v36  ;;  %v7640_v52 = vand.u32 4294901760, %v7634_v5 }
 0x44b   : > { %9354 = vmatmul.mubr.f32.vlgmr.msra.gmra.mrb[12].mxu1 %v4951_v13 }
 0x44c   : > { %9357 = vmatpush3.msra.mxu1 %v4886_v15  ;;  %9358 = vmatprep.mubr.msk.f32.mxu1 %vm10157_vm0, %v10158_v1  ;;  %v7717_v10 = vsub.f32 %v7634_v5, %v7640_v52 }
 0x44d   : > { %9391 = vmatprep.subr.mxu1 %v10158_v1 }
 0x44e   : > { %v7718_v15 = vand.u32 4294901760, %v7717_v10 }
 0x450   : > { %v7719_v19 = vsub.f32 %v7717_v10, %v7718_v15 }
 0x452   : > { %v7720_v16 = vand.u32 4294901760, %v7719_v19 }
 0x453   : > { %9359 = vmatmul.mubr.f32.vlgmr.msra.gmra.mrb[12].mxu1 %v4951_v13 }
 0x454   : > { %v9974_v42 = vpop.eup %9973  ;;  %9392 = vmatpush3.msra.mxu1 %v5804_v34  ;;  %9393 = vmatprep.mubr.msk.f32.mxu1 %vm10157_vm0, %v10158_v1 }
 0x455   : > { %9396 = vmatprep.subr.mxu1 %v10158_v1  ;;  %v6712_v30 = vsel %vm1197_vm3, %v9974_v42, 0.0  ;;  %v6719_v44 = vsel %vm1197_vm3, %v9974_v42, 0 }
 0x456   : > { %6713 = vadd.xlane.f32.xlu0 %v6712_v30  ;;  %v10824_v47 = vand.u32 4294901760, %v6719_v44 }
 0x457   : > { %9394 = vmatmul.mubr.f32.vlgmr.msra.gmra.mrb[14].mxu1 %v5873_v43 }
 0x458   : > { %9397 = vmatpush3.msra.mxu1 %v5884_v45  ;;  %9398 = vmatprep.mubr.msk.f32.mxu1 %vm10157_vm0, %v10158_v1  ;;  %v6788_v54 = vsub.f32 %v6719_v44, %v10824_v47  ;;  %v246_v44 = vld [vmem:[#allocation7] sm:$0xff] }
 0x459   : > { %9401 = vmatprep.subr.mxu1 %v10158_v1 }
 0x45a   : > { %v6789_v58 = vand.u32 4294901760, %v6788_v54 }
 0x45c   : > { %v6790_v61 = vsub.f32 %v6788_v54, %v6789_v58 }
 0x45e   : > { %v6791_v2 = vand.u32 4294901760, %v6790_v61 }
 0x45f   : > { %9399 = vmatmul.mubr.f32.vlgmr.msra.gmra.mrb[14].mxu1 %v5869_v32 }
 0x460   : > { %9402 = vmatpush3.msra.mxu1 %v5881_v38  ;;  %9403 = vmatprep.mubr.msk.f32.mxu1 %vm10157_vm0, %v10158_v1 }
 0x461   : > { %9406 = vmatprep.subr.mxu1 %v10158_v1 }
 0x467   : > { %9404 = vmatmul.mubr.f32.vlgmr.msra.gmra.mrb[14].mxu1 %v5870_v37 }
 0x468   : > { %9407 = vmatpush3.msra.mxu1 %v5804_v34  ;;  %9408 = vmatprep.mubr.msk.f32.mxu1 %vm10157_vm0, %v10158_v1 }
 0x469   : > { %9411 = vmatprep.subr.mxu1 %v10158_v1 }
 0x46f   : > { %9409 = vmatmul.mubr.f32.vlgmr.msra.gmra.mrb[14].mxu1 %v5871_v39 }
 0x470   : > { %9412 = vmatpush3.msra.mxu1 %v5882_v18  ;;  %9413 = vmatprep.mubr.msk.f32.mxu1 %vm10157_vm0, %v10158_v1 }
 0x471   : > { %v7626_v50 = vpop.xlane.xlu0 %7625  ;;  %9416 = vmatprep.subr.mxu1 %v10158_v1 }
 0x472   : > { %v7627_v49 = vsub.f32 %v10745_v48, %v7626_v50  ;;  %v8138_v50 = vand.u32 4294901760, %v246_v44 }
 0x474   : > { %v7628_v53 = vmul.f32 1.442695, %v7627_v49 }
 0x475   : > { %v3042_v21 = vpop.xlane.xlu0 %3041 }
 0x476   : > { %9975 = vpow2.f32 %v7628_v53  ;;  %v10829_v56 = vpop.f32.mrb[4].mxu1  ;;  %v10878_v53 = vsub.f32 %v246_v44, %v8138_v50 }
 0x477   : > { %v9120_v57 = vpop.f32.mrb[5].mxu1  ;;  %9414 = vmatmul.mubr.f32.vlgmr.msra.gmra.mrb[14].mxu1 %v5869_v32 }
 0x478   : > { %9417 = vmatpush3.msra.mxu1 %v5804_v34  ;;  %9418 = vmatprep.mubr.msk.f32.mxu1 %vm10157_vm0, %v10158_v1  ;;  %v249_v57 = vld [vmem:[#allocation7 + $0x18] sm:$0xff]  ;;  %v8219_v61 = vand.u32 4294901760, %v10878_v53 }
 0x479   : > { %9451 = vmatprep.subr.mxu1 %v10158_v1  ;;  %v3960_v9 = vpop.xlane.xlu0 %3959 }
 0x47a   : > { %v2124_v6 = vpop.xlane.xlu1 %2123 }
 0x47b   : > { %9977 = vrcp.f32 %v2124_v6 }
 0x47c   : > { %9979 = vrcp.f32 %v3042_v21 }
 0x47d   : > { %9981 = vrcp.f32 %v3960_v9 }
 0x47f   : > { %9419 = vmatmul.mubr.f32.vlgmr.msra.gmra.mrb[14].mxu1 %v5869_v32 }
 0x480   : > { %v9976_v48 = vpop.eup %9975  ;;  %9452 = vmatpush3.msra.mxu1 %v6722_v51  ;;  %9453 = vmatprep.mubr.msk.f32.mxu1 %vm10157_vm0, %v10158_v1 }
 0x481   : > { %9456 = vmatprep.subr.mxu1 %v10158_v1  ;;  %v7630_v63 = vsel %vm1197_vm3, %v9976_v48, 0.0  ;;  %v7637_v59 = vsel %vm1197_vm3, %v9976_v48, 0 }
 0x482   : > { %7631 = vadd.xlane.f32.xlu0 %v7630_v63  ;;  %v7705_v7 = vand.u32 4294901760, %v7637_v59 }
 0x483   : > { %9454 = vmatmul.mubr.f32.vlgmr.msra.gmra.mrb[16].mxu1 %v6791_v2 }
 0x484   : > { %9457 = vmatpush3.msra.mxu1 %v6802_v3  ;;  %9458 = vmatprep.mubr.msk.f32.mxu1 %vm10157_vm0, %v10158_v1  ;;  %v7706_v23 = vsub.f32 %v7637_v59, %v7705_v7  ;;  %v8220_v3 = vsub.f32 %v10878_v53, %v8219_v61 }
 0x485   : > { %9461 = vmatprep.subr.mxu1 %v10158_v1  ;;  %v9978_v8 = vpop.eup %9977 }
 0x486   : > { %1205 = vadd.xlane.f32.xlu0 %v1204_v4  ;;  %v7707_v14 = vand.u32 4294901760, %v7706_v23  ;;  %v9980_v22 = vpop.eup %9979  ;;  %v8221_v59 = vand.u32 4294901760, %v8220_v3 }
 0x487   : > { %v9982_v27 = vpop.eup %9981 }
 0x488   : > { %v7708_v17 = vsub.f32 %v7706_v23, %v7707_v14 }
 0x48a   : > { %v7709_v20 = vand.u32 4294901760, %v7708_v17 }
 0x48b   : > { %9459 = vmatmul.mubr.f32.vlgmr.msra.gmra.mrb[16].mxu1 %v10824_v47  ;;  %v4878_v32 = vpop.xlane.xlu0 %4877 }
 0x48c   : > { %9462 = vmatpush3.msra.mxu1 %v6799_v55  ;;  %9463 = vmatprep.mubr.msk.f32.mxu1 %vm10157_vm0, %v10158_v1  ;;  %9983 = vrcp.f32 %v4878_v32  ;;  %v248_v55 = vld [vmem:[#allocation7 + $0x10] sm:$0xff] }
 0x48d   : > { %9466 = vmatprep.subr.mxu1 %v10158_v1 }
 0x493   : > { %9464 = vmatmul.mubr.f32.vlgmr.msra.gmra.mrb[16].mxu1 %v6788_v54 }
 0x494   : > { %9467 = vmatpush3.msra.mxu1 %v6722_v51  ;;  %9468 = vmatprep.mubr.msk.f32.mxu1 %vm10157_vm0, %v10158_v1 }
 0x495   : > { %9471 = vmatprep.subr.mxu1 %v10158_v1 }
 0x496   : > { %v9984_v33 = vpop.eup %9983 }
 0x49b   : > { %9469 = vmatmul.mubr.f32.vlgmr.msra.gmra.mrb[16].mxu1 %v6789_v58  ;;  %v8144_v58 = vand.u32 4294901760, %v248_v55 }
 0x49c   : > { %9472 = vmatpush3.msra.mxu1 %v6800_v60  ;;  %9473 = vmatprep.mubr.msk.f32.mxu1 %vm10157_vm0, %v10158_v1  ;;  %v8147_v60 = vand.u32 4294901760, %v249_v57 }
 0x49d   : > { %9476 = vmatprep.subr.mxu1 %v10158_v1  ;;  %v10888_v63 = vsub.f32 %v248_v55, %v8144_v58 }
 0x49e   : > { %v10886_v48 = vpack.c.bf16 %v8147_v60, %v8144_v58  ;;  %v10890_v2 = vsub.f32 %v249_v57, %v8147_v60 }
 0x4a2   : > { %v2573_v11 = vpop.f32.mrb[6].mxu1 }
 0x4a3   : > { %v2579_v12 = vmul.f32 %v9978_v8, %v2573_v11  ;;  %v9180_v13 = vpop.f32.mrb[7].mxu1  ;;  %9474 = vmatmul.mubr.f32.vlgmr.msra.gmra.mrb[16].mxu1 %v10824_v47 }
 0x4a4   : > { %9477 = vmatpush3.msra.mxu1 %v6722_v51  ;;  %9478 = vmatprep.mubr.msk.f32.mxu1 %vm10157_vm0, %v10158_v1 }
 0x4a5   : > { %8089 = vrot.lane.b32.xlu0 %v2579_v12, %s10182_s24  ;;  %9511 = vmatprep.subr.mxu1 %v10158_v1  ;;  %s8624_s24 = scalar_lea.sflag [#allocation4], %s10384_s29 }
 0x4ab   : > { %9479 = vmatmul.mubr.f32.vlgmr.msra.gmra.mrb[16].mxu1 %v10824_v47  ;;  %v247_v47 = vld [vmem:[#allocation7 + $0x8] sm:$0xff] }
 0x4ac   : > { %9512 = vmatpush3.msra.mxu1 %v7640_v52  ;;  %9513 = vmatprep.mubr.msk.f32.mxu1 %vm10157_vm0, %v10158_v1  ;;  %v8141_v51 = vand.u32 4294901760, %v247_v47 }
 0x4ad   : > { %9516 = vmatprep.subr.mxu1 %v10158_v1 }
 0x4ae   : > { %v10876_v49 = vpack.c.bf16 %v8141_v51, %v8138_v50  ;;  %v10880_v54 = vsub.f32 %v247_v47, %v8141_v51 }
 0x4af   : > { %9514 = vmatmul.mubr.f32.vlgmr.msra.gmra.mrb[18].mxu1 %v7709_v20  ;;  %v9659_v20 = vpack.c.bf16 %v10890_v2, %v10888_v63 }
 0x4b0   : > { %9517 = vmatpush3.msra.mxu1 %v7720_v16  ;;  %9518 = vmatprep.mubr.msk.f32.mxu1 %vm10157_vm0, %v10158_v1  ;;  %v8226_v62 = vand.u32 4294901760, %v10880_v54  ;;  %v9656_v19 = vpack.c.bf16 %v10880_v54, %v10878_v53 }
 0x4b1   : > { %9521 = vmatprep.subr.mxu1 %v10158_v1  ;;  %9645 = vmatpush3.bf16.msra.mxu0 %v10876_v49 }
 0x4b2   : > { %9646 = vmatprep.subr.bf16.mxu0 %v10156_v0  ;;  %v8227_v4 = vsub.f32 %v10880_v54, %v8226_v62  ;;  %v9668_v16 = vpack.c.bf16 %v8226_v62, %v8219_v61 }
 0x4b5   : > { %9648 = vmatpush3.bf16.msra.mxu0 %v10886_v48 }
 0x4b6   : > { %9649 = vmatprep.subr.bf16.mxu0 %v10156_v0 }
 0x4b7   : > { %9519 = vmatmul.mubr.f32.vlgmr.msra.gmra.mrb[18].mxu1 %v7705_v7  ;;  %v5796_v37 = vpop.xlane.xlu0 %5795 }
 0x4b8   : > { %9522 = vmatpush3.msra.mxu1 %v7717_v10  ;;  %9523 = vmatprep.mubr.msk.f32.mxu1 %vm10157_vm0, %v10158_v1  ;;  %9985 = vrcp.f32 %v5796_v37  ;;  %v8228_v10 = vand.u32 4294901760, %v8227_v4 }
 0x4b9   : > { %9526 = vmatprep.subr.mxu1 %v10158_v1 }
 0x4ba   : > { %v9650_v13 = vpack.c.bf16 %v8228_v10, %v8221_v59 }
 0x4bf   : > { %9524 = vmatmul.mubr.f32.vlgmr.msra.gmra.mrb[18].mxu1 %v7706_v23 }
 0x4c0   : > { %9527 = vmatpush3.msra.mxu1 %v7640_v52  ;;  %9528 = vmatprep.mubr.msk.f32.mxu1 %vm10157_vm0, %v10158_v1 }
 0x4c1   : > { %9531 = vmatprep.subr.mxu1 %v10158_v1 }
 0x4c2   : > { %v9986_v38 = vpop.eup %9985 }
 0x4c7   : > { %9529 = vmatmul.mubr.f32.vlgmr.msra.gmra.mrb[18].mxu1 %v7707_v14 }
 0x4c8   : > { %9532 = vmatpush3.msra.mxu1 %v7718_v15  ;;  %9533 = vmatprep.mubr.msk.f32.mxu1 %vm10157_vm0, %v10158_v1 }
 0x4c9   : > { %9536 = vmatprep.subr.mxu1 %v10158_v1 }
 0x4ce   : > { %v3491_v24 = vpop.f32.mrb[8].mxu1 }
 0x4cf   : > { %v3497_v25 = vmul.f32 %v9980_v22, %v3491_v24  ;;  %v9240_v26 = vpop.f32.mrb[9].mxu1  ;;  %9534 = vmatmul.mubr.f32.vlgmr.msra.gmra.mrb[18].mxu1 %v7705_v7 }
 0x4d0   : > { %9537 = vmatpush3.msra.mxu1 %v7640_v52  ;;  %9538 = vmatprep.mubr.msk.f32.mxu1 %vm10157_vm0, %v10158_v1  ;;  %v8240_v52 = vand.u32 4294901760, %v10890_v2 }
 0x4d1   : > { %8093 = vrot.lane.b32.xlu1 %v3497_v25, %s10183_s20  ;;  %s10083_s20 = sshll.u32 %s10189_s25, 4  ;;  %s10084_s20 = int_to_ptr.vmem [resolvable:$false] %s10083_s20 }
 0x4d2   : > { %v8241_v12 = vsub.f32 %v10890_v2, %v8240_v52  ;;  %p10086_p7 = scmp.lt.s32.totalorder %s10942_s5, %s10084_s20 }
 0x4d4   : > { %v8242_v15 = vand.u32 4294901760, %v8241_v12 }
 0x4d7   : > { %9539 = vmatmul.mubr.f32.vlgmr.msra.gmra.mrb[18].mxu1 %v7705_v7  ;;  %v8233_v7 = vand.u32 4294901760, %v10888_v63 }
 0x4d9   : > { %v8234_v11 = vsub.f32 %v10888_v63, %v8233_v7  ;;  %v9671_v21 = vpack.c.bf16 %v8240_v52, %v8233_v7 }
 0x4db   : > { %v8235_v14 = vand.u32 4294901760, %v8234_v11 }
 0x4dd   : > { %v9653_v17 = vpack.c.bf16 %v8242_v15, %v8235_v14 }
 0x4e3   : > { %v6714_v41 = vpop.xlane.xlu0 %6713 }
 0x4e4   : > { %9987 = vrcp.f32 %v6714_v41 }
 0x4ee   : > { %v9988_v42 = vpop.eup %9987 }
 0x4fa   : > { %v4409_v28 = vpop.f32.mrb[10].mxu1 }
 0x4fb   : > { %v4415_v29 = vmul.f32 %v9982_v27, %v4409_v28  ;;  %v9300_v31 = vpop.f32.mrb[11].mxu1 }
 0x4fd   : > { %8097 = vrot.lane.b32.xlu0 %v4415_v29, %s10184_s28  ;;  %s10085_s28 = scalar_lea.vmem %s10084_s20, 256 }
 0x4fe   : > { %p10087_p9 = scmp.lt.s32.totalorder %s10085_s28, %s10079_s19 }
 0x500   : > { %p10088_p12 = por %p10087_p9, %p10086_p7 }
 0x502   : > { %p10089_p2 = pnand %p10088_p12, %p10082_p3 }
 0x50f   : > { %v7632_v46 = vpop.xlane.xlu0 %7631 }
 0x510   : > { %9989 = vrcp.f32 %v7632_v46 }
 0x513   : > { %v1206_v22 = vpop.xlane.xlu0 %1205 }
 0x514   : > { %9991 = vrcp.f32 %v1206_v22 }
 0x517   : > { %v8090_v25 = vpop.permute.xlu0 %8089 }
 0x51a   : > { %v9990_v5 = vpop.eup %9989 }
 0x51e   : > { %v9992_v24 = vpop.eup %9991 }
 0x51f   : > { %v1661_v9 = vmul.f32 %v9992_v24, %v10829_v56 }
 0x521   : > { %v8116_v29 = vsel %vm745_vm2, %v1661_v9, %v8090_v25 }
 0x526   : > { %v5327_v34 = vpop.f32.mrb[12].mxu1 }
 0x527   : > { %v5333_v35 = vmul.f32 %v9984_v33, %v5327_v34  ;;  %v9360_v36 = vpop.f32.mrb[13].mxu1 }
 0x529   : > { %8101 = vrot.lane.b32.xlu1 %v5333_v35, %s10185_s11 }
 0x543   : > { %v8094_v26 = vpop.permute.xlu1 %8093 }
 0x544   : > { %v8117_v31 = vsel %vm1197_vm3, %v8116_v29, %v8094_v26 }
 0x552   : > { %v6245_v39 = vpop.f32.mrb[14].mxu1 }
 0x553   : > { %v6251_v18 = vmul.f32 %v9986_v38, %v6245_v39  ;;  %v9420_v40 = vpop.f32.mrb[15].mxu1 }
 0x555   : > { %8105 = vrot.lane.b32.xlu0 %v6251_v18, %s10186_s12 }
 0x56f   : > { %v8098_v27 = vpop.permute.xlu0 %8097 }
 0x570   : > { %v8119_v33 = vsel %vm8118_vm4, %v8117_v31, %v8098_v27 }
 0x57e   : > { %v7163_v30 = vpop.f32.mrb[16].mxu1 }
 0x57f   : > { %v7169_v43 = vmul.f32 %v9988_v42, %v7163_v30  ;;  %v9480_v45 = vpop.f32.mrb[17].mxu1 }
 0x581   : > { %8109 = vrot.lane.b32.xlu1 %v7169_v43, %s10187_s7  ;;  %v8738_v43 = vld [vmem:[%s10988_s3] ss:$0 sm:$0xff] }
 0x59b   : > { %v8102_v28 = vpop.permute.xlu1 %8101 }
 0x59c   : > { %v8121_v35 = vsel %vm8120_vm5, %v8119_v33, %v8102_v28 }
 0x5aa   : > { %v8081_v6 = vpop.f32.mrb[18].mxu1 }
 0x5ab   : > { %v8087_v23 = vmul.f32 %v9990_v5, %v8081_v6  ;;  %v9540_v8 = vpop.f32.mrb[19].mxu1 }
 0x5ad   : > { %8113 = vrot.lane.b32.xlu0 %v8087_v23, %s10188_s8 }
 0x5c7   : > { %v8106_v32 = vpop.permute.xlu0 %8105 }
 0x5c8   : > { %v8123_v36 = vsel %vm8122_vm6, %v8121_v35, %v8106_v32 }
 0x5f3   : > { %v8110_v34 = vpop.permute.xlu1 %8109 }
 0x5f4   : > { %v8125_v37 = vsel %vm8124_vm7, %v8123_v36, %v8110_v34 }
 0x61f   : > { %v8114_v38 = vpop.permute.xlu0 %8113 }
 0x620   : > { %v8127_v39 = vsel %vm8126_vm8, %v8125_v37, %v8114_v38 }
 0x621   : > { %v8135_v56 = vsel %vm252_vm1, %v8127_v39, 0 }
 0x622   : > { %v8206_v18 = vand.u32 4294901760, %v8135_v56 }
 0x624   : > { %v8207_v40 = vsub.f32 %v8135_v56, %v8206_v18 }
 0x626   : > { %v8208_v41 = vand.u32 4294901760, %v8207_v40 }
 0x628   : > { %v8209_v42 = vsub.f32 %v8207_v40, %v8208_v41 }
 0x62a   : > { %v8210_v30 = vand.u32 4294901760, %v8209_v42 }
 0x62c   : > { %9550 = vmatmul.mubr.f32.vlgmr.msra.gmra.mrb[16].mxu0 %v8210_v30 }
 0x62d   : > { %9651 = vmatpush3.bf16.msra.mxu0 %v9650_v13  ;;  %9560 = vmatprep.mubr.msk.f32.mxu0 %vm10157_vm0, %v10158_v1 }
 0x62e   : > { %9652 = vmatprep.subr.bf16.mxu0 %v10156_v0 }
 0x631   : > { %9654 = vmatpush3.bf16.msra.mxu0 %v9653_v17 }
 0x632   : > { %9655 = vmatprep.subr.bf16.mxu0 %v10156_v0 }
 0x634   : > { %9561 = vmatmul.mubr.f32.vlgmr.msra.gmra.mrb[16].mxu0 %v8206_v18 }
 0x635   : > { %9657 = vmatpush3.bf16.msra.mxu0 %v9656_v19  ;;  %9571 = vmatprep.mubr.msk.f32.mxu0 %vm10157_vm0, %v10158_v1 }
 0x636   : > { %9658 = vmatprep.subr.bf16.mxu0 %v10156_v0 }
 0x639   : > { %9660 = vmatpush3.bf16.msra.mxu0 %v9659_v20 }
 0x63a   : > { %9661 = vmatprep.subr.bf16.mxu0 %v10156_v0 }
 0x63c   : > { %9572 = vmatmul.mubr.f32.vlgmr.msra.gmra.mrb[16].mxu0 %v8207_v40 }
 0x63d   : > { %9663 = vmatpush3.bf16.msra.mxu0 %v10876_v49  ;;  %9582 = vmatprep.mubr.msk.f32.mxu0 %vm10157_vm0, %v10158_v1 }
 0x63e   : > { %9664 = vmatprep.subr.bf16.mxu0 %v10156_v0 }
 0x641   : > { %9666 = vmatpush3.bf16.msra.mxu0 %v10886_v48 }
 0x642   : > { %9667 = vmatprep.subr.bf16.mxu0 %v10156_v0 }
 0x644   : > { %9583 = vmatmul.mubr.f32.vlgmr.msra.gmra.mrb[16].mxu0 %v8208_v41 }
 0x645   : > { %9669 = vmatpush3.bf16.msra.mxu0 %v9668_v16  ;;  %9593 = vmatprep.mubr.msk.f32.mxu0 %vm10157_vm0, %v10158_v1 }
 0x646   : > { %9670 = vmatprep.subr.bf16.mxu0 %v10156_v0 }
 0x649   : > { %9672 = vmatpush3.bf16.msra.mxu0 %v9671_v21 }
 0x64a   : > { %9673 = vmatprep.subr.bf16.mxu0 %v10156_v0 }
 0x64c   : > { %9594 = vmatmul.mubr.f32.vlgmr.msra.gmra.mrb[16].mxu0 %v8206_v18 }
 0x64d   : > { %9675 = vmatpush3.bf16.msra.mxu0 %v10876_v49  ;;  %9604 = vmatprep.mubr.msk.f32.mxu0 %vm10157_vm0, %v10158_v1 }
 0x64e   : > { %9676 = vmatprep.subr.bf16.mxu0 %v10156_v0 }
 0x651   : > { %9678 = vmatpush3.bf16.msra.mxu0 %v10886_v48 }
 0x654   : > { %9605 = vmatmul.mubr.f32.vlgmr.msra.gmra.mrb[16].mxu0 %v8206_v18 }
 0x727   : > { %v8618_v45 = vpop.f32.mrb[16].mxu0 }
 0x728   : > { %v9680_v46 = vadd.f32 %v8738_v43, %v8618_v45  ;;  %v9606_v44 = vpop.f32.mrb[17].mxu0 }
 0x72a   : > { %8622 = vst.msk [vmem:[%s241_s30] sm:$0xff] %vm252_vm1, %v9680_v46 }
 0x72b   : > { %10092 = shalt.err (!%p10089_p2)
}
 0x72c   : > { %s10093_s29 = scalar_lea.hbm %s10940_s10, 128  ;;  %s10097_s7 = scalar_lea.hbm %s10989_s4, 256 }
 0x72d   : > { %p10094_p13 = scmp.ne.s32.totalorder %s10940_s10, %s10093_s29  ;;  %p10098_p4 = scmp.lt.u32.totalorder %s10940_s10, %s10989_s4 }
 0x72e   : > { %p10099_p5 = scmp.lt.u32.totalorder %s10097_s7, %s10093_s29  ;;  %p10101_p11 = scmp.lt.u32.totalorder %s10093_s29, %s10940_s10 }
 0x72f   : > { %p10095_p6 = pnand %p10094_p13, %p11003_p0 }
 0x730   : > { %p10100_p8 = por %p10099_p5, %p10098_p4 }
 0x731   : > { %p10096_p10 = pneg %p10095_p6 }
 0x732   : > { %p10102_p1 = por %p10101_p11, %p10100_p8 }
 0x734   : > { %p10103_p3 = pnand %p10102_p1, %p10096_p10 }
 0x736   : > { %10106 = shalt.err (!%p10103_p3)
}
 0x737   : > { %9869 = dma.vmem_to_hbm [thread:$0]  (%p11003_p0), %s10942_s5, 128, %s10940_s10, %s8624_s24  }
 0x738 PF: > { %s8649_s23 = sand.u32 1, %s10137_s15   ;;  %p11004_p7 = scmp.ne.s32.totalorder %s10994_s22, 0 }
 0x739   : > { %p11005_p9 = scmp.ge.s32.totalorder %s10149_s18, 2  ;;  %s8650_s27 = scalar_lea.sflag [#allocation4], %s8649_s23 }
 0x73b   : > { %p9883_p12 = pnand %p11005_p9, %p11004_p7 }
 0x73d   : > { %10132 = dma.done.wait (!%p9883_p12), %s8650_s27, 128  }
 0x73e   : > { %10134 = vsyncadd (!%p9883_p12), %s8650_s27, 4294967168  ;;  %p18_p2 = scmp.ge.s32.totalorder %s10325_s9, 4   ;;  %s11006_s15 = smov %s10141_s16 }
 0x73f   : > { %s11007_s16 = smov %s10145_s17  ;;  %s11008_s17 = smov %s10341_s14 }
 0x740   : > { %s11009_s18 = smov %s10325_s9  ;;  %20 = sbr.rel (!%p18_p2) target bundleno = 6 (0x6), region = 89 }
 0x747   :  { %8655 = vsyncpa [#allocation3], 1 }
 0x748   :  { %8657 = vsyncpa [#allocation3 + $0x1], 1 }
 0x749   :  { %8658 = vsyncpa [#allocation6], 1 }
 0x74a   :  { %8659 = vsyncpa [#allocation4], 1 }
 0x74b   :  { %8661 = vsyncpa [#allocation4 + $0x1], 1 }

</bundles_post_ra>
